<compile_context>
chip_gen: v6e
topology: v6e:2x2x1
jax: 0.10.0
libtpu: 0.0.40
codegen_flags: <defaults>
</compile_context>

<pallas_src>
import functools
import math

import jax
import jax.numpy as jnp
import numpy as np
from jax.experimental import pallas as pl
from jax.experimental.pallas import tpu as pltpu


def _layernorm(x, w, b, eps=1e-5):
    mu = jnp.mean(x, axis=-1, keepdims=True)
    var = jnp.mean(jnp.square(x - mu), axis=-1, keepdims=True)
    return (x - mu) * jax.lax.rsqrt(var + eps) * w + b


def mha_block_kernel(x_ref, ln_ref, bias_ref, wqkv_ref, wo_ref, w1_ref, w2_ref, o_ref, *, heads):
    f32, bf16 = jnp.float32, jnp.bfloat16
    Bb, S, D = x_ref.shape
    hd = D // heads

    # (Bb, S, D) -> (Bb*S, D): every projection/FFN matmul sees Bb*S MXU rows.
    x = x_ref[...].reshape(Bb * S, D)                     # f32

    ln1_w, ln1_b = ln_ref[0:1], ln_ref[1:2]
    ln2_w, ln2_b = ln_ref[2:3], ln_ref[3:4]

    # ---- pre-norm 1 (f32, VPU/EUP) ----
    n1 = _layernorm(x, ln1_w, ln1_b)

    # ---- fused QKV projection: ONE (rows, D) x (D, 3D) MXU matmul, bf16 in / f32 acc ----
    qkv = jnp.dot(n1.astype(bf16), wqkv_ref[...], preferred_element_type=f32)   # (rows, 3D)
    # 1/sqrt(hd) is already folded into the Q columns and Q bias (wrapper-side).
    q = (qkv[:, :D] + bias_ref[0:1]).reshape(Bb, S, D)
    k = (qkv[:, D:2 * D] + bias_ref[1:2]).reshape(Bb, S, D)
    v = (qkv[:, 2 * D:] + bias_ref[2:3]).reshape(Bb, S, D)

    # ---- per-head attention (static unrolled loop over heads, batched over Bb) ----
    # Head split = static lane slices of the fused projection output; context pieces are
    # concatenated back along lanes so the output projection needs no head-merge transpose.
    ctx_heads = []
    for h in range(heads):
        sl = slice(h * hd, (h + 1) * hd)
        qh = q[:, :, sl].astype(bf16)                     # (Bb, S, hd)
        kh = k[:, :, sl].astype(bf16)
        vh = v[:, :, sl].astype(bf16)
        s = jnp.einsum('bqd,bkd->bqk', qh, kh, preferred_element_type=f32)       # (Bb, S, S)
        s = s - jnp.max(s, axis=-1, keepdims=True)
        p = jnp.exp(s)                                    # f32 exp (portable across v5e/v6e/v7x)
        p = p * pl.reciprocal(jnp.sum(p, axis=-1, keepdims=True), approx=True)   # EUP
        ctx_heads.append(jnp.einsum('bqk,bkd->bqd', p.astype(bf16), vh,
                                    preferred_element_type=f32))                 # (Bb, S, hd)
    ctx = jnp.concatenate(ctx_heads, axis=-1).reshape(Bb * S, D)                 # (rows, D)

    # ---- output projection: single matmul; head reduction happens inside the MXU accumulator ----
    attn = jnp.dot(ctx.astype(bf16), wo_ref[...], preferred_element_type=f32) + bias_ref[3:4]
    x1 = x + attn                                         # first residual (f32)

    # ---- pre-norm 2 + FFN: Linear -> GELU(tanh, EUP) -> Linear ----
    n2 = _layernorm(x1, ln2_w, ln2_b)
    h1 = jnp.dot(n2.astype(bf16), w1_ref[...], preferred_element_type=f32) + bias_ref[4:5]
    g = jax.nn.gelu(h1, approximate=True)
    y = jnp.dot(g.astype(bf16), w2_ref[...], preferred_element_type=f32) + bias_ref[5:6]

    o_ref[...] = (x1 + y).reshape(Bb, S, D).astype(o_ref.dtype)   # second residual


def mha_block(x, p, heads, *, block_b=None, target_rows=256):
    B, S, D = x.shape
    assert D % heads == 0, "embed dim must be divisible by heads"
    hd = D // heads
    scale = 1.0 / math.sqrt(hd)
    bf16, f32 = jnp.bfloat16, jnp.float32

    # Rows-per-step: largest divisor of B with block_b*S <= target_rows (fills MXU rows and
    # amortizes per-grid-step overhead).  At the toy shape this folds the whole batch into one
    # step; at larger B it keeps multiple "parallel" steps for megacore / dual-TC sharding.
    if block_b is None:
        block_b = 1
        for cand in range(1, B + 1):
            if B % cand == 0 and cand * S <= max(S, target_rows):
                block_b = cand
    grid_b = B // block_b

    # ---- parameter packing (wrapper-side, free) ----
    w_qkv = p["w_qkv"]                                           # (D, 3D) == in_proj_weight.T
    w_qkv = jnp.concatenate([w_qkv[:, :D] * scale, w_qkv[:, D:]], axis=1).astype(bf16)
    w_o = p["w_o"].astype(bf16)                                  # (D, D)  == out_proj.weight.T
    w1 = p["w1"].astype(bf16)
    w2 = p["w2"].astype(bf16)

    b3 = p["b_qkv"].reshape(3, D)                                # rows: bq, bk, bv
    biases = jnp.stack([b3[0] * scale, b3[1], b3[2],
                        p["b_o"].reshape(D), p["b1"].reshape(D), p["b2"].reshape(D)],
                       axis=0).astype(f32)                       # (6, D)
    ln_params = jnp.concatenate([p["ln1_w"].reshape(1, D), p["ln1_b"].reshape(1, D),
                                 p["ln2_w"].reshape(1, D), p["ln2_b"].reshape(1, D)],
                                axis=0).astype(f32)              # (4, D)

    weights = [ln_params, biases, w_qkv, w_o, w1, w2]
    kernel = functools.partial(mha_block_kernel, heads=heads)

    def build(single_buffer_weights):
        def const_spec(arr):
            zeros = (0,) * arr.ndim
            kwargs = {}
            if single_buffer_weights:
                # Grid-invariant weights: single-buffer (halves weight-resident VMEM vs the
                # default double-buffering; matters on v7x's 64 MiB VMEM at realistic D).
                kwargs["pipeline_mode"] = pl.Buffered(1)
            return pl.BlockSpec(arr.shape, lambda b, _z=zeros: _z, **kwargs)

        in_specs = [pl.BlockSpec((block_b, S, D), lambda b: (b, 0, 0))]
        in_specs += [const_spec(w) for w in weights]
        out_spec = pl.BlockSpec((block_b, S, D), lambda b: (b, 0, 0))

        return pl.pallas_call(
            kernel,
            out_shape=jax.ShapeDtypeStruct((B, S, D), x.dtype),
            grid_spec=pltpu.PrefetchScalarGridSpec(
                num_scalar_prefetch=0,
                grid=(grid_b,),
                in_specs=in_specs,
                out_specs=out_spec,
            ),
            compiler_params=pltpu.CompilerParams(
                dimension_semantics=("parallel",),
                vmem_limit_bytes=48 * 1024 * 1024,   # explicit budget; fits v7x (64 MiB) with headroom
            ),
        )

    try:
        out = build(True)(x, *weights)
        jax.block_until_ready(out)
        return out
    except Exception:
        # Fallback for JAX builds without BlockSpec pipeline_mode / pl.Buffered support.
        return build(False)(x, *weights)


def mha_block_ref(x, p, heads):
    """Pure-JAX f32 reference mirroring the PyTorch forward (exact erf GELU)."""
    B, S, D = x.shape
    hd = D // heads

    def ln(y, w, b):
        mu = y.mean(-1, keepdims=True)
        var = ((y - mu) ** 2).mean(-1, keepdims=True)
        return (y - mu) / jnp.sqrt(var + 1e-5) * w + b

    n1 = ln(x, p["ln1_w"], p["ln1_b"])
    qkv = n1 @ p["w_qkv"] + p["b_qkv"]
    q, k, v = jnp.split(qkv, 3, axis=-1)
    q = q.reshape(B, S, heads, hd).transpose(0, 2, 1, 3)
    k = k.reshape(B, S, heads, hd).transpose(0, 2, 1, 3)
    v = v.reshape(B, S, heads, hd).transpose(0, 2, 1, 3)
    s = jnp.einsum("bhqd,bhkd->bhqk", q, k) / jnp.sqrt(hd)
    a = jax.nn.softmax(s, axis=-1)
    ctx = jnp.einsum("bhqk,bhkd->bhqd", a, v).transpose(0, 2, 1, 3).reshape(B, S, D)
    x1 = x + ctx @ p["w_o"] + p["b_o"]
    n2 = ln(x1, p["ln2_w"], p["ln2_b"])
    h1 = jax.nn.gelu(n2 @ p["w1"] + p["b1"], approximate=False)
    return x1 + h1 @ p["w2"] + p["b2"]


if __name__ == "__main__":
    B, S, D, H = 2, 8, 32, 4
    key = jax.random.PRNGKey(0)
    keys = jax.random.split(key, 13)

    # Deterministic synthetic parameters (shapes follow nn.LayerNorm(dim),
    # nn.MultiheadAttention(dim, heads) in/out projections, and the two Linear(dim, dim) of the FFN).
    params = {
        "ln1_w": jnp.ones((1, D), jnp.float32) + 0.05 * jax.random.normal(keys[0], (1, D), jnp.float32),
        "ln1_b": 0.05 * jax.random.normal(keys[1], (1, D), jnp.float32),
        "w_qkv": 0.2 * jax.random.normal(keys[2], (D, 3 * D), jnp.float32),   # in_proj_weight.T
        "b_qkv": 0.05 * jax.random.normal(keys[3], (1, 3 * D), jnp.float32),  # in_proj_bias
        "w_o":   0.2 * jax.random.normal(keys[4], (D, D), jnp.float32),       # out_proj.weight.T
        "b_o":   0.05 * jax.random.normal(keys[5], (1, D), jnp.float32),
        "ln2_w": jnp.ones((1, D), jnp.float32) + 0.05 * jax.random.normal(keys[6], (1, D), jnp.float32),
        "ln2_b": 0.05 * jax.random.normal(keys[7], (1, D), jnp.float32),
        "w1":    0.2 * jax.random.normal(keys[8], (D, D), jnp.float32),
        "b1":    0.05 * jax.random.normal(keys[9], (1, D), jnp.float32),
        "w2":    0.2 * jax.random.normal(keys[10], (D, D), jnp.float32),
        "b2":    0.05 * jax.random.normal(keys[11], (1, D), jnp.float32),
    }
    x = jax.random.normal(keys[12], (B, S, D), jnp.float32)

    out = mha_block(x, params, H)
    jax.block_until_ready(out)

    ref = mha_block_ref(x, params, H)
    np.testing.assert_allclose(np.asarray(out), np.asarray(ref), rtol=2e-2, atol=2e-2)
    print("KERNEL_OK")
</pallas_src>

<mosaic_0001>
module attributes {stable_mosaic.version = 11 : i64} {
  func.func @mha_block_kernel(%arg0: i32, %arg1: memref<2x8x32xf32, #tpu.memory_space<vmem>>, %arg2: memref<4x32xf32, #tpu.memory_space<vmem>>, %arg3: memref<6x32xf32, #tpu.memory_space<vmem>>, %arg4: memref<32x96xbf16, #tpu.memory_space<vmem>>, %arg5: memref<32x32xbf16, #tpu.memory_space<vmem>>, %arg6: memref<32x32xbf16, #tpu.memory_space<vmem>>, %arg7: memref<32x32xbf16, #tpu.memory_space<vmem>>, %arg8: memref<2x8x32xf32, #tpu.memory_space<vmem>>) attributes {dimension_semantics = [#tpu.dimension_semantics<parallel>], iteration_bounds = array<i64: 1>, scalar_prefetch = 0 : i64, scratch_operands = 0 : i64, tpu.core_type = #tpu.core_type<tc>, window_params = [{transform_indices = @transform_0, window_bounds = array<i64: 2, 8, 32>}, {pipeline_mode = #tpu.pipeline_mode<synchronous>, transform_indices = @transform_1, window_bounds = array<i64: 4, 32>}, {pipeline_mode = #tpu.pipeline_mode<synchronous>, transform_indices = @transform_2, window_bounds = array<i64: 6, 32>}, {pipeline_mode = #tpu.pipeline_mode<synchronous>, transform_indices = @transform_3, window_bounds = array<i64: 32, 96>}, {pipeline_mode = #tpu.pipeline_mode<synchronous>, transform_indices = @transform_4, window_bounds = array<i64: 32, 32>}, {pipeline_mode = #tpu.pipeline_mode<synchronous>, transform_indices = @transform_5, window_bounds = array<i64: 32, 32>}, {pipeline_mode = #tpu.pipeline_mode<synchronous>, transform_indices = @transform_6, window_bounds = array<i64: 32, 32>}, {transform_indices = @transform_7, window_bounds = array<i64: 2, 8, 32>}]} {
    %c0 = arith.constant 0 : index
    %c0_0 = arith.constant 0 : index
    %c0_1 = arith.constant 0 : index
    %0 = vector.load %arg1[%c0, %c0_0, %c0_1] : memref<2x8x32xf32, #tpu.memory_space<vmem>>, vector<2x8x32xf32>
    %1 = vector.shape_cast %0 : vector<2x8x32xf32> to vector<16x32xf32>
    %c0_2 = arith.constant 0 : index
    %c0_3 = arith.constant 0 : index
    %2 = vector.load %arg2[%c0_2, %c0_3] : memref<4x32xf32, #tpu.memory_space<vmem>>, vector<1x32xf32>
    %c1 = arith.constant 1 : index
    %c0_4 = arith.constant 0 : index
    %3 = vector.load %arg2[%c1, %c0_4] : memref<4x32xf32, #tpu.memory_space<vmem>>, vector<1x32xf32>
    %c2 = arith.constant 2 : index
    %c0_5 = arith.constant 0 : index
    %4 = vector.load %arg2[%c2, %c0_5] : memref<4x32xf32, #tpu.memory_space<vmem>>, vector<1x32xf32>
    %c3 = arith.constant 3 : index
    %c0_6 = arith.constant 0 : index
    %5 = vector.load %arg2[%c3, %c0_6] : memref<4x32xf32, #tpu.memory_space<vmem>>, vector<1x32xf32>
    %cst = arith.constant dense<0.000000e+00> : vector<16xf32>
    %6 = vector.multi_reduction <add>, %1, %cst [1] : vector<16x32xf32> to vector<16xf32>
    %7 = vector.shape_cast %6 : vector<16xf32> to vector<16x1xf32>
    %cst_7 = arith.constant 3.200000e+01 : f32
    %8 = vector.broadcast %cst_7 : f32 to vector<16x1xf32>
    %9 = arith.divf %7, %8 : vector<16x1xf32>
    %10 = vector.broadcast %9 : vector<16x1xf32> to vector<16x32xf32>
    %11 = arith.subf %1, %10 : vector<16x32xf32>
    %12 = arith.mulf %11, %11 : vector<16x32xf32>
    %cst_8 = arith.constant dense<0.000000e+00> : vector<16xf32>
    %13 = vector.multi_reduction <add>, %12, %cst_8 [1] : vector<16x32xf32> to vector<16xf32>
    %14 = vector.shape_cast %13 : vector<16xf32> to vector<16x1xf32>
    %cst_9 = arith.constant 3.200000e+01 : f32
    %15 = vector.broadcast %cst_9 : f32 to vector<16x1xf32>
    %16 = arith.divf %14, %15 : vector<16x1xf32>
    %17 = vector.broadcast %9 : vector<16x1xf32> to vector<16x32xf32>
    %18 = arith.subf %1, %17 : vector<16x32xf32>
    %cst_10 = arith.constant 9.99999974E-6 : f32
    %19 = vector.broadcast %cst_10 : f32 to vector<16x1xf32>
    %20 = arith.addf %16, %19 : vector<16x1xf32>
    %21 = math.rsqrt %20 : vector<16x1xf32>
    %22 = vector.broadcast %21 : vector<16x1xf32> to vector<16x32xf32>
    %23 = arith.mulf %18, %22 : vector<16x32xf32>
    %24 = vector.broadcast %2 : vector<1x32xf32> to vector<16x32xf32>
    %25 = arith.mulf %23, %24 : vector<16x32xf32>
    %26 = vector.broadcast %3 : vector<1x32xf32> to vector<16x32xf32>
    %27 = arith.addf %25, %26 : vector<16x32xf32>
    %28 = arith.truncf %27 : vector<16x32xf32> to vector<16x32xbf16>
    %c0_11 = arith.constant 0 : index
    %c0_12 = arith.constant 0 : index
    %29 = vector.load %arg4[%c0_11, %c0_12] : memref<32x96xbf16, #tpu.memory_space<vmem>>, vector<32x96xbf16>
    %cst_13 = arith.constant dense<0.000000e+00> : vector<16x96xf32>
    %30 = tpu.matmul %28, %29, %cst_13 {dimension_numbers = #tpu.dot_dimension_numbers<[1], [0], [0], [1], [0, 0, 1, 1], [], []>} : vector<16x32xbf16>, vector<32x96xbf16>, vector<16x96xf32> -> vector<16x96xf32>
    %31 = vector.extract_strided_slice %30 {offsets = [0, 0], sizes = [16, 32], strides = [1, 1]} : vector<16x96xf32> to vector<16x32xf32>
    %c0_14 = arith.constant 0 : index
    %c0_15 = arith.constant 0 : index
    %32 = vector.load %arg3[%c0_14, %c0_15] : memref<6x32xf32, #tpu.memory_space<vmem>>, vector<1x32xf32>
    %33 = vector.broadcast %32 : vector<1x32xf32> to vector<16x32xf32>
    %34 = arith.addf %31, %33 : vector<16x32xf32>
    %35 = vector.shape_cast %34 : vector<16x32xf32> to vector<2x8x32xf32>
    %36 = vector.extract_strided_slice %30 {offsets = [0, 32], sizes = [16, 32], strides = [1, 1]} : vector<16x96xf32> to vector<16x32xf32>
    %c1_16 = arith.constant 1 : index
    %c0_17 = arith.constant 0 : index
    %37 = vector.load %arg3[%c1_16, %c0_17] : memref<6x32xf32, #tpu.memory_space<vmem>>, vector<1x32xf32>
    %38 = vector.broadcast %37 : vector<1x32xf32> to vector<16x32xf32>
    %39 = arith.addf %36, %38 : vector<16x32xf32>
    %40 = vector.shape_cast %39 : vector<16x32xf32> to vector<2x8x32xf32>
    %41 = vector.extract_strided_slice %30 {offsets = [0, 64], sizes = [16, 32], strides = [1, 1]} : vector<16x96xf32> to vector<16x32xf32>
    %c2_18 = arith.constant 2 : index
    %c0_19 = arith.constant 0 : index
    %42 = vector.load %arg3[%c2_18, %c0_19] : memref<6x32xf32, #tpu.memory_space<vmem>>, vector<1x32xf32>
    %43 = vector.broadcast %42 : vector<1x32xf32> to vector<16x32xf32>
    %44 = arith.addf %41, %43 : vector<16x32xf32>
    %45 = vector.shape_cast %44 : vector<16x32xf32> to vector<2x8x32xf32>
    %46 = vector.extract_strided_slice %35 {offsets = [0, 0, 0], sizes = [2, 8, 8], strides = [1, 1, 1]} : vector<2x8x32xf32> to vector<2x8x8xf32>
    %47 = arith.truncf %46 : vector<2x8x8xf32> to vector<2x8x8xbf16>
    %48 = vector.extract_strided_slice %40 {offsets = [0, 0, 0], sizes = [2, 8, 8], strides = [1, 1, 1]} : vector<2x8x32xf32> to vector<2x8x8xf32>
    %49 = arith.truncf %48 : vector<2x8x8xf32> to vector<2x8x8xbf16>
    %50 = vector.extract_strided_slice %45 {offsets = [0, 0, 0], sizes = [2, 8, 8], strides = [1, 1, 1]} : vector<2x8x32xf32> to vector<2x8x8xf32>
    %51 = arith.truncf %50 : vector<2x8x8xf32> to vector<2x8x8xbf16>
    "tpu.trace_start"() <{level = 10 : i32, message = "bqd,bkd->bqk"}> : () -> ()
    %cst_20 = arith.constant dense<0.000000e+00> : vector<2x8x8xf32>
    %52 = tpu.matmul %47, %49, %cst_20 {dimension_numbers = #tpu.dot_dimension_numbers<[2], [2], [1], [1], [0, 0, 0, 1, 1, 1], [0], [0]>} : vector<2x8x8xbf16>, vector<2x8x8xbf16>, vector<2x8x8xf32> -> vector<2x8x8xf32>
    "tpu.trace_stop"() : () -> ()
    %cst_21 = arith.constant dense<0xFF800000> : vector<2x8xf32>
    %53 = vector.multi_reduction <maximumf>, %52, %cst_21 [2] : vector<2x8x8xf32> to vector<2x8xf32>
    %54 = vector.shape_cast %53 : vector<2x8xf32> to vector<2x8x1xf32>
    %55 = vector.broadcast %54 : vector<2x8x1xf32> to vector<2x8x8xf32>
    %56 = arith.subf %52, %55 : vector<2x8x8xf32>
    %57 = math.exp %56 : vector<2x8x8xf32>
    %cst_22 = arith.constant dense<0.000000e+00> : vector<2x8xf32>
    %58 = vector.multi_reduction <add>, %57, %cst_22 [2] : vector<2x8x8xf32> to vector<2x8xf32>
    %59 = vector.shape_cast %58 : vector<2x8xf32> to vector<2x8x1xf32>
    %60 = tpu.reciprocal %59 {approx = true} : vector<2x8x1xf32> -> vector<2x8x1xf32>
    %61 = vector.broadcast %60 : vector<2x8x1xf32> to vector<2x8x8xf32>
    %62 = arith.mulf %57, %61 : vector<2x8x8xf32>
    %63 = arith.truncf %62 : vector<2x8x8xf32> to vector<2x8x8xbf16>
    "tpu.trace_start"() <{level = 10 : i32, message = "bqk,bkd->bqd"}> : () -> ()
    %cst_23 = arith.constant dense<0.000000e+00> : vector<2x8x8xf32>
    %64 = tpu.matmul %63, %51, %cst_23 {dimension_numbers = #tpu.dot_dimension_numbers<[2], [1], [1], [2], [0, 0, 0, 1, 1, 2], [0], [0]>} : vector<2x8x8xbf16>, vector<2x8x8xbf16>, vector<2x8x8xf32> -> vector<2x8x8xf32>
    "tpu.trace_stop"() : () -> ()
    %65 = vector.extract_strided_slice %35 {offsets = [0, 0, 8], sizes = [2, 8, 8], strides = [1, 1, 1]} : vector<2x8x32xf32> to vector<2x8x8xf32>
    %66 = arith.truncf %65 : vector<2x8x8xf32> to vector<2x8x8xbf16>
    %67 = vector.extract_strided_slice %40 {offsets = [0, 0, 8], sizes = [2, 8, 8], strides = [1, 1, 1]} : vector<2x8x32xf32> to vector<2x8x8xf32>
    %68 = arith.truncf %67 : vector<2x8x8xf32> to vector<2x8x8xbf16>
    %69 = vector.extract_strided_slice %45 {offsets = [0, 0, 8], sizes = [2, 8, 8], strides = [1, 1, 1]} : vector<2x8x32xf32> to vector<2x8x8xf32>
    %70 = arith.truncf %69 : vector<2x8x8xf32> to vector<2x8x8xbf16>
    "tpu.trace_start"() <{level = 10 : i32, message = "bqd,bkd->bqk"}> : () -> ()
    %cst_24 = arith.constant dense<0.000000e+00> : vector<2x8x8xf32>
    %71 = tpu.matmul %66, %68, %cst_24 {dimension_numbers = #tpu.dot_dimension_numbers<[2], [2], [1], [1], [0, 0, 0, 1, 1, 1], [0], [0]>} : vector<2x8x8xbf16>, vector<2x8x8xbf16>, vector<2x8x8xf32> -> vector<2x8x8xf32>
    "tpu.trace_stop"() : () -> ()
    %cst_25 = arith.constant dense<0xFF800000> : vector<2x8xf32>
    %72 = vector.multi_reduction <maximumf>, %71, %cst_25 [2] : vector<2x8x8xf32> to vector<2x8xf32>
    %73 = vector.shape_cast %72 : vector<2x8xf32> to vector<2x8x1xf32>
    %74 = vector.broadcast %73 : vector<2x8x1xf32> to vector<2x8x8xf32>
    %75 = arith.subf %71, %74 : vector<2x8x8xf32>
    %76 = math.exp %75 : vector<2x8x8xf32>
    %cst_26 = arith.constant dense<0.000000e+00> : vector<2x8xf32>
    %77 = vector.multi_reduction <add>, %76, %cst_26 [2] : vector<2x8x8xf32> to vector<2x8xf32>
    %78 = vector.shape_cast %77 : vector<2x8xf32> to vector<2x8x1xf32>
    %79 = tpu.reciprocal %78 {approx = true} : vector<2x8x1xf32> -> vector<2x8x1xf32>
    %80 = vector.broadcast %79 : vector<2x8x1xf32> to vector<2x8x8xf32>
    %81 = arith.mulf %76, %80 : vector<2x8x8xf32>
    %82 = arith.truncf %81 : vector<2x8x8xf32> to vector<2x8x8xbf16>
    "tpu.trace_start"() <{level = 10 : i32, message = "bqk,bkd->bqd"}> : () -> ()
    %cst_27 = arith.constant dense<0.000000e+00> : vector<2x8x8xf32>
    %83 = tpu.matmul %82, %70, %cst_27 {dimension_numbers = #tpu.dot_dimension_numbers<[2], [1], [1], [2], [0, 0, 0, 1, 1, 2], [0], [0]>} : vector<2x8x8xbf16>, vector<2x8x8xbf16>, vector<2x8x8xf32> -> vector<2x8x8xf32>
    "tpu.trace_stop"() : () -> ()
    %84 = vector.extract_strided_slice %35 {offsets = [0, 0, 16], sizes = [2, 8, 8], strides = [1, 1, 1]} : vector<2x8x32xf32> to vector<2x8x8xf32>
    %85 = arith.truncf %84 : vector<2x8x8xf32> to vector<2x8x8xbf16>
    %86 = vector.extract_strided_slice %40 {offsets = [0, 0, 16], sizes = [2, 8, 8], strides = [1, 1, 1]} : vector<2x8x32xf32> to vector<2x8x8xf32>
    %87 = arith.truncf %86 : vector<2x8x8xf32> to vector<2x8x8xbf16>
    %88 = vector.extract_strided_slice %45 {offsets = [0, 0, 16], sizes = [2, 8, 8], strides = [1, 1, 1]} : vector<2x8x32xf32> to vector<2x8x8xf32>
    %89 = arith.truncf %88 : vector<2x8x8xf32> to vector<2x8x8xbf16>
    "tpu.trace_start"() <{level = 10 : i32, message = "bqd,bkd->bqk"}> : () -> ()
    %cst_28 = arith.constant dense<0.000000e+00> : vector<2x8x8xf32>
    %90 = tpu.matmul %85, %87, %cst_28 {dimension_numbers = #tpu.dot_dimension_numbers<[2], [2], [1], [1], [0, 0, 0, 1, 1, 1], [0], [0]>} : vector<2x8x8xbf16>, vector<2x8x8xbf16>, vector<2x8x8xf32> -> vector<2x8x8xf32>
    "tpu.trace_stop"() : () -> ()
    %cst_29 = arith.constant dense<0xFF800000> : vector<2x8xf32>
    %91 = vector.multi_reduction <maximumf>, %90, %cst_29 [2] : vector<2x8x8xf32> to vector<2x8xf32>
    %92 = vector.shape_cast %91 : vector<2x8xf32> to vector<2x8x1xf32>
    %93 = vector.broadcast %92 : vector<2x8x1xf32> to vector<2x8x8xf32>
    %94 = arith.subf %90, %93 : vector<2x8x8xf32>
    %95 = math.exp %94 : vector<2x8x8xf32>
    %cst_30 = arith.constant dense<0.000000e+00> : vector<2x8xf32>
    %96 = vector.multi_reduction <add>, %95, %cst_30 [2] : vector<2x8x8xf32> to vector<2x8xf32>
    %97 = vector.shape_cast %96 : vector<2x8xf32> to vector<2x8x1xf32>
    %98 = tpu.reciprocal %97 {approx = true} : vector<2x8x1xf32> -> vector<2x8x1xf32>
    %99 = vector.broadcast %98 : vector<2x8x1xf32> to vector<2x8x8xf32>
    %100 = arith.mulf %95, %99 : vector<2x8x8xf32>
    %101 = arith.truncf %100 : vector<2x8x8xf32> to vector<2x8x8xbf16>
    "tpu.trace_start"() <{level = 10 : i32, message = "bqk,bkd->bqd"}> : () -> ()
    %cst_31 = arith.constant dense<0.000000e+00> : vector<2x8x8xf32>
    %102 = tpu.matmul %101, %89, %cst_31 {dimension_numbers = #tpu.dot_dimension_numbers<[2], [1], [1], [2], [0, 0, 0, 1, 1, 2], [0], [0]>} : vector<2x8x8xbf16>, vector<2x8x8xbf16>, vector<2x8x8xf32> -> vector<2x8x8xf32>
    "tpu.trace_stop"() : () -> ()
    %103 = vector.extract_strided_slice %35 {offsets = [0, 0, 24], sizes = [2, 8, 8], strides = [1, 1, 1]} : vector<2x8x32xf32> to vector<2x8x8xf32>
    %104 = arith.truncf %103 : vector<2x8x8xf32> to vector<2x8x8xbf16>
    %105 = vector.extract_strided_slice %40 {offsets = [0, 0, 24], sizes = [2, 8, 8], strides = [1, 1, 1]} : vector<2x8x32xf32> to vector<2x8x8xf32>
    %106 = arith.truncf %105 : vector<2x8x8xf32> to vector<2x8x8xbf16>
    %107 = vector.extract_strided_slice %45 {offsets = [0, 0, 24], sizes = [2, 8, 8], strides = [1, 1, 1]} : vector<2x8x32xf32> to vector<2x8x8xf32>
    %108 = arith.truncf %107 : vector<2x8x8xf32> to vector<2x8x8xbf16>
    "tpu.trace_start"() <{level = 10 : i32, message = "bqd,bkd->bqk"}> : () -> ()
    %cst_32 = arith.constant dense<0.000000e+00> : vector<2x8x8xf32>
    %109 = tpu.matmul %104, %106, %cst_32 {dimension_numbers = #tpu.dot_dimension_numbers<[2], [2], [1], [1], [0, 0, 0, 1, 1, 1], [0], [0]>} : vector<2x8x8xbf16>, vector<2x8x8xbf16>, vector<2x8x8xf32> -> vector<2x8x8xf32>
    "tpu.trace_stop"() : () -> ()
    %cst_33 = arith.constant dense<0xFF800000> : vector<2x8xf32>
    %110 = vector.multi_reduction <maximumf>, %109, %cst_33 [2] : vector<2x8x8xf32> to vector<2x8xf32>
    %111 = vector.shape_cast %110 : vector<2x8xf32> to vector<2x8x1xf32>
    %112 = vector.broadcast %111 : vector<2x8x1xf32> to vector<2x8x8xf32>
    %113 = arith.subf %109, %112 : vector<2x8x8xf32>
    %114 = math.exp %113 : vector<2x8x8xf32>
    %cst_34 = arith.constant dense<0.000000e+00> : vector<2x8xf32>
    %115 = vector.multi_reduction <add>, %114, %cst_34 [2] : vector<2x8x8xf32> to vector<2x8xf32>
    %116 = vector.shape_cast %115 : vector<2x8xf32> to vector<2x8x1xf32>
    %117 = tpu.reciprocal %116 {approx = true} : vector<2x8x1xf32> -> vector<2x8x1xf32>
    %118 = vector.broadcast %117 : vector<2x8x1xf32> to vector<2x8x8xf32>
    %119 = arith.mulf %114, %118 : vector<2x8x8xf32>
    %120 = arith.truncf %119 : vector<2x8x8xf32> to vector<2x8x8xbf16>
    "tpu.trace_start"() <{level = 10 : i32, message = "bqk,bkd->bqd"}> : () -> ()
    %cst_35 = arith.constant dense<0.000000e+00> : vector<2x8x8xf32>
    %121 = tpu.matmul %120, %108, %cst_35 {dimension_numbers = #tpu.dot_dimension_numbers<[2], [1], [1], [2], [0, 0, 0, 1, 1, 2], [0], [0]>} : vector<2x8x8xbf16>, vector<2x8x8xbf16>, vector<2x8x8xf32> -> vector<2x8x8xf32>
    "tpu.trace_stop"() : () -> ()
    %122 = tpu.concatenate %64, %83, %102, %121 in 2 : vector<2x8x8xf32>, vector<2x8x8xf32>, vector<2x8x8xf32>, vector<2x8x8xf32> -> vector<2x8x32xf32>
    %123 = vector.shape_cast %122 : vector<2x8x32xf32> to vector<16x32xf32>
    %124 = arith.truncf %123 : vector<16x32xf32> to vector<16x32xbf16>
    %c0_36 = arith.constant 0 : index
    %c0_37 = arith.constant 0 : index
    %125 = vector.load %arg5[%c0_36, %c0_37] : memref<32x32xbf16, #tpu.memory_space<vmem>>, vector<32x32xbf16>
    %cst_38 = arith.constant dense<0.000000e+00> : vector<16x32xf32>
    %126 = tpu.matmul %124, %125, %cst_38 {dimension_numbers = #tpu.dot_dimension_numbers<[1], [0], [0], [1], [0, 0, 1, 1], [], []>} : vector<16x32xbf16>, vector<32x32xbf16>, vector<16x32xf32> -> vector<16x32xf32>
    %c3_39 = arith.constant 3 : index
    %c0_40 = arith.constant 0 : index
    %127 = vector.load %arg3[%c3_39, %c0_40] : memref<6x32xf32, #tpu.memory_space<vmem>>, vector<1x32xf32>
    %128 = vector.broadcast %127 : vector<1x32xf32> to vector<16x32xf32>
    %129 = arith.addf %126, %128 : vector<16x32xf32>
    %130 = arith.addf %1, %129 : vector<16x32xf32>
    %cst_41 = arith.constant dense<0.000000e+00> : vector<16xf32>
    %131 = vector.multi_reduction <add>, %130, %cst_41 [1] : vector<16x32xf32> to vector<16xf32>
    %132 = vector.shape_cast %131 : vector<16xf32> to vector<16x1xf32>
    %cst_42 = arith.constant 3.200000e+01 : f32
    %133 = vector.broadcast %cst_42 : f32 to vector<16x1xf32>
    %134 = arith.divf %132, %133 : vector<16x1xf32>
    %135 = vector.broadcast %134 : vector<16x1xf32> to vector<16x32xf32>
    %136 = arith.subf %130, %135 : vector<16x32xf32>
    %137 = arith.mulf %136, %136 : vector<16x32xf32>
    %cst_43 = arith.constant dense<0.000000e+00> : vector<16xf32>
    %138 = vector.multi_reduction <add>, %137, %cst_43 [1] : vector<16x32xf32> to vector<16xf32>
    %139 = vector.shape_cast %138 : vector<16xf32> to vector<16x1xf32>
    %cst_44 = arith.constant 3.200000e+01 : f32
    %140 = vector.broadcast %cst_44 : f32 to vector<16x1xf32>
    %141 = arith.divf %139, %140 : vector<16x1xf32>
    %142 = vector.broadcast %134 : vector<16x1xf32> to vector<16x32xf32>
    %143 = arith.subf %130, %142 : vector<16x32xf32>
    %cst_45 = arith.constant 9.99999974E-6 : f32
    %144 = vector.broadcast %cst_45 : f32 to vector<16x1xf32>
    %145 = arith.addf %141, %144 : vector<16x1xf32>
    %146 = math.rsqrt %145 : vector<16x1xf32>
    %147 = vector.broadcast %146 : vector<16x1xf32> to vector<16x32xf32>
    %148 = arith.mulf %143, %147 : vector<16x32xf32>
    %149 = vector.broadcast %4 : vector<1x32xf32> to vector<16x32xf32>
    %150 = arith.mulf %148, %149 : vector<16x32xf32>
    %151 = vector.broadcast %5 : vector<1x32xf32> to vector<16x32xf32>
    %152 = arith.addf %150, %151 : vector<16x32xf32>
    %153 = arith.truncf %152 : vector<16x32xf32> to vector<16x32xbf16>
    %c0_46 = arith.constant 0 : index
    %c0_47 = arith.constant 0 : index
    %154 = vector.load %arg6[%c0_46, %c0_47] : memref<32x32xbf16, #tpu.memory_space<vmem>>, vector<32x32xbf16>
    %cst_48 = arith.constant dense<0.000000e+00> : vector<16x32xf32>
    %155 = tpu.matmul %153, %154, %cst_48 {dimension_numbers = #tpu.dot_dimension_numbers<[1], [0], [0], [1], [0, 0, 1, 1], [], []>} : vector<16x32xbf16>, vector<32x32xbf16>, vector<16x32xf32> -> vector<16x32xf32>
    %c4 = arith.constant 4 : index
    %c0_49 = arith.constant 0 : index
    %156 = vector.load %arg3[%c4, %c0_49] : memref<6x32xf32, #tpu.memory_space<vmem>>, vector<1x32xf32>
    %157 = vector.broadcast %156 : vector<1x32xf32> to vector<16x32xf32>
    %158 = arith.addf %155, %157 : vector<16x32xf32>
    %159 = arith.mulf %158, %158 : vector<16x32xf32>
    %160 = arith.mulf %158, %159 : vector<16x32xf32>
    %cst_50 = arith.constant 4.471500e-02 : f32
    %161 = vector.broadcast %cst_50 : f32 to vector<16x32xf32>
    %162 = arith.mulf %161, %160 : vector<16x32xf32>
    %163 = arith.addf %158, %162 : vector<16x32xf32>
    %cst_51 = arith.constant 0.797884583 : f32
    %164 = vector.broadcast %cst_51 : f32 to vector<16x32xf32>
    %165 = arith.mulf %164, %163 : vector<16x32xf32>
    %166 = math.tanh %165 : vector<16x32xf32>
    %cst_52 = arith.constant 1.000000e+00 : f32
    %167 = vector.broadcast %cst_52 : f32 to vector<16x32xf32>
    %168 = arith.addf %167, %166 : vector<16x32xf32>
    %cst_53 = arith.constant 5.000000e-01 : f32
    %169 = vector.broadcast %cst_53 : f32 to vector<16x32xf32>
    %170 = arith.mulf %169, %168 : vector<16x32xf32>
    %171 = arith.mulf %158, %170 : vector<16x32xf32>
    %172 = arith.truncf %171 : vector<16x32xf32> to vector<16x32xbf16>
    %c0_54 = arith.constant 0 : index
    %c0_55 = arith.constant 0 : index
    %173 = vector.load %arg7[%c0_54, %c0_55] : memref<32x32xbf16, #tpu.memory_space<vmem>>, vector<32x32xbf16>
    %cst_56 = arith.constant dense<0.000000e+00> : vector<16x32xf32>
    %174 = tpu.matmul %172, %173, %cst_56 {dimension_numbers = #tpu.dot_dimension_numbers<[1], [0], [0], [1], [0, 0, 1, 1], [], []>} : vector<16x32xbf16>, vector<32x32xbf16>, vector<16x32xf32> -> vector<16x32xf32>
    %c5 = arith.constant 5 : index
    %c0_57 = arith.constant 0 : index
    %175 = vector.load %arg3[%c5, %c0_57] : memref<6x32xf32, #tpu.memory_space<vmem>>, vector<1x32xf32>
    %176 = vector.broadcast %175 : vector<1x32xf32> to vector<16x32xf32>
    %177 = arith.addf %174, %176 : vector<16x32xf32>
    %178 = arith.addf %130, %177 : vector<16x32xf32>
    %179 = vector.shape_cast %178 : vector<16x32xf32> to vector<2x8x32xf32>
    %c0_58 = arith.constant 0 : index
    %c0_59 = arith.constant 0 : index
    %c0_60 = arith.constant 0 : index
    %180 = vector.load %arg8[%c0_58, %c0_59, %c0_60] : memref<2x8x32xf32, #tpu.memory_space<vmem>>, vector<2x8x32xf32>
    tpu.vector_store %arg8[%c0_58, %c0_59, %c0_60], %179 {strides = array<i32>} : memref<2x8x32xf32, #tpu.memory_space<vmem>>, vector<2x8x32xf32>,
    return
  }
  func.func @transform_0(%arg0: i32) -> (i32, i32, i32) {
    %c0_i32 = arith.constant 0 : i32
    %c0_i32_0 = arith.constant 0 : i32
    %c0_i32_1 = arith.constant 0 : i32
    return %arg0, %c0_i32, %c0_i32_0 : i32, i32, i32
  }
  func.func @transform_1(%arg0: i32) -> (i32, i32) {
    %c0_i32 = arith.constant 0 : i32
    %c0_i32_0 = arith.constant 0 : i32
    %c0_i32_1 = arith.constant 0 : i32
    return %c0_i32, %c0_i32_0 : i32, i32
  }
  func.func @transform_2(%arg0: i32) -> (i32, i32) {
    %c0_i32 = arith.constant 0 : i32
    %c0_i32_0 = arith.constant 0 : i32
    %c0_i32_1 = arith.constant 0 : i32
    return %c0_i32, %c0_i32_0 : i32, i32
  }
  func.func @transform_3(%arg0: i32) -> (i32, i32) {
    %c0_i32 = arith.constant 0 : i32
    %c0_i32_0 = arith.constant 0 : i32
    %c0_i32_1 = arith.constant 0 : i32
    return %c0_i32, %c0_i32_0 : i32, i32
  }
  func.func @transform_4(%arg0: i32) -> (i32, i32) {
    %c0_i32 = arith.constant 0 : i32
    %c0_i32_0 = arith.constant 0 : i32
    %c0_i32_1 = arith.constant 0 : i32
    return %c0_i32, %c0_i32_0 : i32, i32
  }
  func.func @transform_5(%arg0: i32) -> (i32, i32) {
    %c0_i32 = arith.constant 0 : i32
    %c0_i32_0 = arith.constant 0 : i32
    %c0_i32_1 = arith.constant 0 : i32
    return %c0_i32, %c0_i32_0 : i32, i32
  }
  func.func @transform_6(%arg0: i32) -> (i32, i32) {
    %c0_i32 = arith.constant 0 : i32
    %c0_i32_0 = arith.constant 0 : i32
    %c0_i32_1 = arith.constant 0 : i32
    return %c0_i32, %c0_i32_0 : i32, i32
  }
  func.func @transform_7(%arg0: i32) -> (i32, i32, i32) {
    %c0_i32 = arith.constant 0 : i32
    %c0_i32_0 = arith.constant 0 : i32
    %c0_i32_1 = arith.constant 0 : i32
    return %arg0, %c0_i32, %c0_i32_0 : i32, i32, i32
  }
}

module attributes {stable_mosaic.version = 11 : i64} {
  func.func @mha_block_kernel(%arg0: i32, %arg1: memref<2x8x32xf32, #tpu.memory_space<vmem>>, %arg2: memref<4x32xf32, #tpu.memory_space<vmem>>, %arg3: memref<6x32xf32, #tpu.memory_space<vmem>>, %arg4: memref<32x96xbf16, #tpu.memory_space<vmem>>, %arg5: memref<32x32xbf16, #tpu.memory_space<vmem>>, %arg6: memref<32x32xbf16, #tpu.memory_space<vmem>>, %arg7: memref<32x32xbf16, #tpu.memory_space<vmem>>, %arg8: memref<2x8x32xf32, #tpu.memory_space<vmem>>) attributes {dimension_semantics = [#tpu.dimension_semantics<parallel>], iteration_bounds = array<i64: 1>, scalar_prefetch = 0 : i64, scratch_operands = 0 : i64, tpu.core_type = #tpu.core_type<tc>, window_params = [{transform_indices = @transform_0, window_bounds = array<i64: 2, 8, 32>}, {pipeline_mode = #tpu.pipeline_mode<synchronous>, transform_indices = @transform_1, window_bounds = array<i64: 4, 32>}, {pipeline_mode = #tpu.pipeline_mode<synchronous>, transform_indices = @transform_2, window_bounds = array<i64: 6, 32>}, {pipeline_mode = #tpu.pipeline_mode<synchronous>, transform_indices = @transform_3, window_bounds = array<i64: 32, 96>}, {pipeline_mode = #tpu.pipeline_mode<synchronous>, transform_indices = @transform_4, window_bounds = array<i64: 32, 32>}, {pipeline_mode = #tpu.pipeline_mode<synchronous>, transform_indices = @transform_5, window_bounds = array<i64: 32, 32>}, {pipeline_mode = #tpu.pipeline_mode<synchronous>, transform_indices = @transform_6, window_bounds = array<i64: 32, 32>}, {transform_indices = @transform_7, window_bounds = array<i64: 2, 8, 32>}]} {
    %c0 = arith.constant 0 : index
    %c0_0 = arith.constant 0 : index
    %c0_1 = arith.constant 0 : index
    %0 = vector.load %arg1[%c0, %c0_0, %c0_1] : memref<2x8x32xf32, #tpu.memory_space<vmem>>, vector<2x8x32xf32>
    %1 = vector.shape_cast %0 : vector<2x8x32xf32> to vector<16x32xf32>
    %c0_2 = arith.constant 0 : index
    %c0_3 = arith.constant 0 : index
    %2 = vector.load %arg2[%c0_2, %c0_3] : memref<4x32xf32, #tpu.memory_space<vmem>>, vector<1x32xf32>
    %c1 = arith.constant 1 : index
    %c0_4 = arith.constant 0 : index
    %3 = vector.load %arg2[%c1, %c0_4] : memref<4x32xf32, #tpu.memory_space<vmem>>, vector<1x32xf32>
    %c2 = arith.constant 2 : index
    %c0_5 = arith.constant 0 : index
    %4 = vector.load %arg2[%c2, %c0_5] : memref<4x32xf32, #tpu.memory_space<vmem>>, vector<1x32xf32>
    %c3 = arith.constant 3 : index
    %c0_6 = arith.constant 0 : index
    %5 = vector.load %arg2[%c3, %c0_6] : memref<4x32xf32, #tpu.memory_space<vmem>>, vector<1x32xf32>
    %cst = arith.constant dense<0.000000e+00> : vector<16xf32>
    %6 = vector.multi_reduction <add>, %1, %cst [1] : vector<16x32xf32> to vector<16xf32>
    %7 = vector.shape_cast %6 : vector<16xf32> to vector<16x1xf32>
    %cst_7 = arith.constant 3.200000e+01 : f32
    %8 = vector.broadcast %cst_7 : f32 to vector<16x1xf32>
    %9 = arith.divf %7, %8 : vector<16x1xf32>
    %10 = vector.broadcast %9 : vector<16x1xf32> to vector<16x32xf32>
    %11 = arith.subf %1, %10 : vector<16x32xf32>
    %12 = arith.mulf %11, %11 : vector<16x32xf32>
    %cst_8 = arith.constant dense<0.000000e+00> : vector<16xf32>
    %13 = vector.multi_reduction <add>, %12, %cst_8 [1] : vector<16x32xf32> to vector<16xf32>
    %14 = vector.shape_cast %13 : vector<16xf32> to vector<16x1xf32>
    %cst_9 = arith.constant 3.200000e+01 : f32
    %15 = vector.broadcast %cst_9 : f32 to vector<16x1xf32>
    %16 = arith.divf %14, %15 : vector<16x1xf32>
    %17 = vector.broadcast %9 : vector<16x1xf32> to vector<16x32xf32>
    %18 = arith.subf %1, %17 : vector<16x32xf32>
    %cst_10 = arith.constant 9.99999974E-6 : f32
    %19 = vector.broadcast %cst_10 : f32 to vector<16x1xf32>
    %20 = arith.addf %16, %19 : vector<16x1xf32>
    %21 = math.rsqrt %20 : vector<16x1xf32>
    %22 = vector.broadcast %21 : vector<16x1xf32> to vector<16x32xf32>
    %23 = arith.mulf %18, %22 : vector<16x32xf32>
    %24 = vector.broadcast %2 : vector<1x32xf32> to vector<16x32xf32>
    %25 = arith.mulf %23, %24 : vector<16x32xf32>
    %26 = vector.broadcast %3 : vector<1x32xf32> to vector<16x32xf32>
    %27 = arith.addf %25, %26 : vector<16x32xf32>
    %28 = arith.truncf %27 : vector<16x32xf32> to vector<16x32xbf16>
    %c0_11 = arith.constant 0 : index
    %c0_12 = arith.constant 0 : index
    %29 = vector.load %arg4[%c0_11, %c0_12] : memref<32x96xbf16, #tpu.memory_space<vmem>>, vector<32x96xbf16>
    %cst_13 = arith.constant dense<0.000000e+00> : vector<16x96xf32>
    %30 = tpu.matmul %28, %29, %cst_13 {dimension_numbers = #tpu.dot_dimension_numbers<[1], [0], [0], [1], [0, 0, 1, 1], [], []>} : vector<16x32xbf16>, vector<32x96xbf16>, vector<16x96xf32> -> vector<16x96xf32>
    %31 = vector.extract_strided_slice %30 {offsets = [0, 0], sizes = [16, 32], strides = [1, 1]} : vector<16x96xf32> to vector<16x32xf32>
    %c0_14 = arith.constant 0 : index
    %c0_15 = arith.constant 0 : index
    %32 = vector.load %arg3[%c0_14, %c0_15] : memref<6x32xf32, #tpu.memory_space<vmem>>, vector<1x32xf32>
    %33 = vector.broadcast %32 : vector<1x32xf32> to vector<16x32xf32>
    %34 = arith.addf %31, %33 : vector<16x32xf32>
    %35 = vector.shape_cast %34 : vector<16x32xf32> to vector<2x8x32xf32>
    %36 = vector.extract_strided_slice %30 {offsets = [0, 32], sizes = [16, 32], strides = [1, 1]} : vector<16x96xf32> to vector<16x32xf32>
    %c1_16 = arith.constant 1 : index
    %c0_17 = arith.constant 0 : index
    %37 = vector.load %arg3[%c1_16, %c0_17] : memref<6x32xf32, #tpu.memory_space<vmem>>, vector<1x32xf32>
    %38 = vector.broadcast %37 : vector<1x32xf32> to vector<16x32xf32>
    %39 = arith.addf %36, %38 : vector<16x32xf32>
    %40 = vector.shape_cast %39 : vector<16x32xf32> to vector<2x8x32xf32>
    %41 = vector.extract_strided_slice %30 {offsets = [0, 64], sizes = [16, 32], strides = [1, 1]} : vector<16x96xf32> to vector<16x32xf32>
    %c2_18 = arith.constant 2 : index
    %c0_19 = arith.constant 0 : index
    %42 = vector.load %arg3[%c2_18, %c0_19] : memref<6x32xf32, #tpu.memory_space<vmem>>, vector<1x32xf32>
    %43 = vector.broadcast %42 : vector<1x32xf32> to vector<16x32xf32>
    %44 = arith.addf %41, %43 : vector<16x32xf32>
    %45 = vector.shape_cast %44 : vector<16x32xf32> to vector<2x8x32xf32>
    %46 = vector.extract_strided_slice %35 {offsets = [0, 0, 0], sizes = [2, 8, 8], strides = [1, 1, 1]} : vector<2x8x32xf32> to vector<2x8x8xf32>
    %47 = arith.truncf %46 : vector<2x8x8xf32> to vector<2x8x8xbf16>
    %48 = vector.extract_strided_slice %40 {offsets = [0, 0, 0], sizes = [2, 8, 8], strides = [1, 1, 1]} : vector<2x8x32xf32> to vector<2x8x8xf32>
    %49 = arith.truncf %48 : vector<2x8x8xf32> to vector<2x8x8xbf16>
    %50 = vector.extract_strided_slice %45 {offsets = [0, 0, 0], sizes = [2, 8, 8], strides = [1, 1, 1]} : vector<2x8x32xf32> to vector<2x8x8xf32>
    %51 = arith.truncf %50 : vector<2x8x8xf32> to vector<2x8x8xbf16>
    "tpu.trace_start"() <{level = 10 : i32, message = "bqd,bkd->bqk"}> : () -> ()
    %cst_20 = arith.constant dense<0.000000e+00> : vector<2x8x8xf32>
    %52 = tpu.matmul %47, %49, %cst_20 {dimension_numbers = #tpu.dot_dimension_numbers<[2], [2], [1], [1], [0, 0, 0, 1, 1, 1], [0], [0]>} : vector<2x8x8xbf16>, vector<2x8x8xbf16>, vector<2x8x8xf32> -> vector<2x8x8xf32>
    "tpu.trace_stop"() : () -> ()
    %cst_21 = arith.constant dense<0xFF800000> : vector<2x8xf32>
    %53 = vector.multi_reduction <maximumf>, %52, %cst_21 [2] : vector<2x8x8xf32> to vector<2x8xf32>
    %54 = vector.shape_cast %53 : vector<2x8xf32> to vector<2x8x1xf32>
    %55 = vector.broadcast %54 : vector<2x8x1xf32> to vector<2x8x8xf32>
    %56 = arith.subf %52, %55 : vector<2x8x8xf32>
    %57 = math.exp %56 : vector<2x8x8xf32>
    %cst_22 = arith.constant dense<0.000000e+00> : vector<2x8xf32>
    %58 = vector.multi_reduction <add>, %57, %cst_22 [2] : vector<2x8x8xf32> to vector<2x8xf32>
    %59 = vector.shape_cast %58 : vector<2x8xf32> to vector<2x8x1xf32>
    %60 = tpu.reciprocal %59 {approx = true} : vector<2x8x1xf32> -> vector<2x8x1xf32>
    %61 = vector.broadcast %60 : vector<2x8x1xf32> to vector<2x8x8xf32>
    %62 = arith.mulf %57, %61 : vector<2x8x8xf32>
    %63 = arith.truncf %62 : vector<2x8x8xf32> to vector<2x8x8xbf16>
    "tpu.trace_start"() <{level = 10 : i32, message = "bqk,bkd->bqd"}> : () -> ()
    %cst_23 = arith.constant dense<0.000000e+00> : vector<2x8x8xf32>
    %64 = tpu.matmul %63, %51, %cst_23 {dimension_numbers = #tpu.dot_dimension_numbers<[2], [1], [1], [2], [0, 0, 0, 1, 1, 2], [0], [0]>} : vector<2x8x8xbf16>, vector<2x8x8xbf16>, vector<2x8x8xf32> -> vector<2x8x8xf32>
    "tpu.trace_stop"() : () -> ()
    %65 = vector.extract_strided_slice %35 {offsets = [0, 0, 8], sizes = [2, 8, 8], strides = [1, 1, 1]} : vector<2x8x32xf32> to vector<2x8x8xf32>
    %66 = arith.truncf %65 : vector<2x8x8xf32> to vector<2x8x8xbf16>
    %67 = vector.extract_strided_slice %40 {offsets = [0, 0, 8], sizes = [2, 8, 8], strides = [1, 1, 1]} : vector<2x8x32xf32> to vector<2x8x8xf32>
    %68 = arith.truncf %67 : vector<2x8x8xf32> to vector<2x8x8xbf16>
    %69 = vector.extract_strided_slice %45 {offsets = [0, 0, 8], sizes = [2, 8, 8], strides = [1, 1, 1]} : vector<2x8x32xf32> to vector<2x8x8xf32>
    %70 = arith.truncf %69 : vector<2x8x8xf32> to vector<2x8x8xbf16>
    "tpu.trace_start"() <{level = 10 : i32, message = "bqd,bkd->bqk"}> : () -> ()
    %cst_24 = arith.constant dense<0.000000e+00> : vector<2x8x8xf32>
    %71 = tpu.matmul %66, %68, %cst_24 {dimension_numbers = #tpu.dot_dimension_numbers<[2], [2], [1], [1], [0, 0, 0, 1, 1, 1], [0], [0]>} : vector<2x8x8xbf16>, vector<2x8x8xbf16>, vector<2x8x8xf32> -> vector<2x8x8xf32>
    "tpu.trace_stop"() : () -> ()
    %cst_25 = arith.constant dense<0xFF800000> : vector<2x8xf32>
    %72 = vector.multi_reduction <maximumf>, %71, %cst_25 [2] : vector<2x8x8xf32> to vector<2x8xf32>
    %73 = vector.shape_cast %72 : vector<2x8xf32> to vector<2x8x1xf32>
    %74 = vector.broadcast %73 : vector<2x8x1xf32> to vector<2x8x8xf32>
    %75 = arith.subf %71, %74 : vector<2x8x8xf32>
    %76 = math.exp %75 : vector<2x8x8xf32>
    %cst_26 = arith.constant dense<0.000000e+00> : vector<2x8xf32>
    %77 = vector.multi_reduction <add>, %76, %cst_26 [2] : vector<2x8x8xf32> to vector<2x8xf32>
    %78 = vector.shape_cast %77 : vector<2x8xf32> to vector<2x8x1xf32>
    %79 = tpu.reciprocal %78 {approx = true} : vector<2x8x1xf32> -> vector<2x8x1xf32>
    %80 = vector.broadcast %79 : vector<2x8x1xf32> to vector<2x8x8xf32>
    %81 = arith.mulf %76, %80 : vector<2x8x8xf32>
    %82 = arith.truncf %81 : vector<2x8x8xf32> to vector<2x8x8xbf16>
    "tpu.trace_start"() <{level = 10 : i32, message = "bqk,bkd->bqd"}> : () -> ()
    %cst_27 = arith.constant dense<0.000000e+00> : vector<2x8x8xf32>
    %83 = tpu.matmul %82, %70, %cst_27 {dimension_numbers = #tpu.dot_dimension_numbers<[2], [1], [1], [2], [0, 0, 0, 1, 1, 2], [0], [0]>} : vector<2x8x8xbf16>, vector<2x8x8xbf16>, vector<2x8x8xf32> -> vector<2x8x8xf32>
    "tpu.trace_stop"() : () -> ()
    %84 = vector.extract_strided_slice %35 {offsets = [0, 0, 16], sizes = [2, 8, 8], strides = [1, 1, 1]} : vector<2x8x32xf32> to vector<2x8x8xf32>
    %85 = arith.truncf %84 : vector<2x8x8xf32> to vector<2x8x8xbf16>
    %86 = vector.extract_strided_slice %40 {offsets = [0, 0, 16], sizes = [2, 8, 8], strides = [1, 1, 1]} : vector<2x8x32xf32> to vector<2x8x8xf32>
    %87 = arith.truncf %86 : vector<2x8x8xf32> to vector<2x8x8xbf16>
    %88 = vector.extract_strided_slice %45 {offsets = [0, 0, 16], sizes = [2, 8, 8], strides = [1, 1, 1]} : vector<2x8x32xf32> to vector<2x8x8xf32>
    %89 = arith.truncf %88 : vector<2x8x8xf32> to vector<2x8x8xbf16>
    "tpu.trace_start"() <{level = 10 : i32, message = "bqd,bkd->bqk"}> : () -> ()
    %cst_28 = arith.constant dense<0.000000e+00> : vector<2x8x8xf32>
    %90 = tpu.matmul %85, %87, %cst_28 {dimension_numbers = #tpu.dot_dimension_numbers<[2], [2], [1], [1], [0, 0, 0, 1, 1, 1], [0], [0]>} : vector<2x8x8xbf16>, vector<2x8x8xbf16>, vector<2x8x8xf32> -> vector<2x8x8xf32>
    "tpu.trace_stop"() : () -> ()
    %cst_29 = arith.constant dense<0xFF800000> : vector<2x8xf32>
    %91 = vector.multi_reduction <maximumf>, %90, %cst_29 [2] : vector<2x8x8xf32> to vector<2x8xf32>
    %92 = vector.shape_cast %91 : vector<2x8xf32> to vector<2x8x1xf32>
    %93 = vector.broadcast %92 : vector<2x8x1xf32> to vector<2x8x8xf32>
    %94 = arith.subf %90, %93 : vector<2x8x8xf32>
    %95 = math.exp %94 : vector<2x8x8xf32>
    %cst_30 = arith.constant dense<0.000000e+00> : vector<2x8xf32>
    %96 = vector.multi_reduction <add>, %95, %cst_30 [2] : vector<2x8x8xf32> to vector<2x8xf32>
    %97 = vector.shape_cast %96 : vector<2x8xf32> to vector<2x8x1xf32>
    %98 = tpu.reciprocal %97 {approx = true} : vector<2x8x1xf32> -> vector<2x8x1xf32>
    %99 = vector.broadcast %98 : vector<2x8x1xf32> to vector<2x8x8xf32>
    %100 = arith.mulf %95, %99 : vector<2x8x8xf32>
    %101 = arith.truncf %100 : vector<2x8x8xf32> to vector<2x8x8xbf16>
    "tpu.trace_start"() <{level = 10 : i32, message = "bqk,bkd->bqd"}> : () -> ()
    %cst_31 = arith.constant dense<0.000000e+00> : vector<2x8x8xf32>
    %102 = tpu.matmul %101, %89, %cst_31 {dimension_numbers = #tpu.dot_dimension_numbers<[2], [1], [1], [2], [0, 0, 0, 1, 1, 2], [0], [0]>} : vector<2x8x8xbf16>, vector<2x8x8xbf16>, vector<2x8x8xf32> -> vector<2x8x8xf32>
    "tpu.trace_stop"() : () -> ()
    %103 = vector.extract_strided_slice %35 {offsets = [0, 0, 24], sizes = [2, 8, 8], strides = [1, 1, 1]} : vector<2x8x32xf32> to vector<2x8x8xf32>
    %104 = arith.truncf %103 : vector<2x8x8xf32> to vector<2x8x8xbf16>
    %105 = vector.extract_strided_slice %40 {offsets = [0, 0, 24], sizes = [2, 8, 8], strides = [1, 1, 1]} : vector<2x8x32xf32> to vector<2x8x8xf32>
    %106 = arith.truncf %105 : vector<2x8x8xf32> to vector<2x8x8xbf16>
    %107 = vector.extract_strided_slice %45 {offsets = [0, 0, 24], sizes = [2, 8, 8], strides = [1, 1, 1]} : vector<2x8x32xf32> to vector<2x8x8xf32>
    %108 = arith.truncf %107 : vector<2x8x8xf32> to vector<2x8x8xbf16>
    "tpu.trace_start"() <{level = 10 : i32, message = "bqd,bkd->bqk"}> : () -> ()
    %cst_32 = arith.constant dense<0.000000e+00> : vector<2x8x8xf32>
    %109 = tpu.matmul %104, %106, %cst_32 {dimension_numbers = #tpu.dot_dimension_numbers<[2], [2], [1], [1], [0, 0, 0, 1, 1, 1], [0], [0]>} : vector<2x8x8xbf16>, vector<2x8x8xbf16>, vector<2x8x8xf32> -> vector<2x8x8xf32>
    "tpu.trace_stop"() : () -> ()
    %cst_33 = arith.constant dense<0xFF800000> : vector<2x8xf32>
    %110 = vector.multi_reduction <maximumf>, %109, %cst_33 [2] : vector<2x8x8xf32> to vector<2x8xf32>
    %111 = vector.shape_cast %110 : vector<2x8xf32> to vector<2x8x1xf32>
    %112 = vector.broadcast %111 : vector<2x8x1xf32> to vector<2x8x8xf32>
    %113 = arith.subf %109, %112 : vector<2x8x8xf32>
    %114 = math.exp %113 : vector<2x8x8xf32>
    %cst_34 = arith.constant dense<0.000000e+00> : vector<2x8xf32>
    %115 = vector.multi_reduction <add>, %114, %cst_34 [2] : vector<2x8x8xf32> to vector<2x8xf32>
    %116 = vector.shape_cast %115 : vector<2x8xf32> to vector<2x8x1xf32>
    %117 = tpu.reciprocal %116 {approx = true} : vector<2x8x1xf32> -> vector<2x8x1xf32>
    %118 = vector.broadcast %117 : vector<2x8x1xf32> to vector<2x8x8xf32>
    %119 = arith.mulf %114, %118 : vector<2x8x8xf32>
    %120 = arith.truncf %119 : vector<2x8x8xf32> to vector<2x8x8xbf16>
    "tpu.trace_start"() <{level = 10 : i32, message = "bqk,bkd->bqd"}> : () -> ()
    %cst_35 = arith.constant dense<0.000000e+00> : vector<2x8x8xf32>
    %121 = tpu.matmul %120, %108, %cst_35 {dimension_numbers = #tpu.dot_dimension_numbers<[2], [1], [1], [2], [0, 0, 0, 1, 1, 2], [0], [0]>} : vector<2x8x8xbf16>, vector<2x8x8xbf16>, vector<2x8x8xf32> -> vector<2x8x8xf32>
    "tpu.trace_stop"() : () -> ()
    %122 = tpu.concatenate %64, %83, %102, %121 in 2 : vector<2x8x8xf32>, vector<2x8x8xf32>, vector<2x8x8xf32>, vector<2x8x8xf32> -> vector<2x8x32xf32>
    %123 = vector.shape_cast %122 : vector<2x8x32xf32> to vector<16x32xf32>
    %124 = arith.truncf %123 : vector<16x32xf32> to vector<16x32xbf16>
    %c0_36 = arith.constant 0 : index
    %c0_37 = arith.constant 0 : index
    %125 = vector.load %arg5[%c0_36, %c0_37] : memref<32x32xbf16, #tpu.memory_space<vmem>>, vector<32x32xbf16>
    %cst_38 = arith.constant dense<0.000000e+00> : vector<16x32xf32>
    %126 = tpu.matmul %124, %125, %cst_38 {dimension_numbers = #tpu.dot_dimension_numbers<[1], [0], [0], [1], [0, 0, 1, 1], [], []>} : vector<16x32xbf16>, vector<32x32xbf16>, vector<16x32xf32> -> vector<16x32xf32>
    %c3_39 = arith.constant 3 : index
    %c0_40 = arith.constant 0 : index
    %127 = vector.load %arg3[%c3_39, %c0_40] : memref<6x32xf32, #tpu.memory_space<vmem>>, vector<1x32xf32>
    %128 = vector.broadcast %127 : vector<1x32xf32> to vector<16x32xf32>
    %129 = arith.addf %126, %128 : vector<16x32xf32>
    %130 = arith.addf %1, %129 : vector<16x32xf32>
    %cst_41 = arith.constant dense<0.000000e+00> : vector<16xf32>
    %131 = vector.multi_reduction <add>, %130, %cst_41 [1] : vector<16x32xf32> to vector<16xf32>
    %132 = vector.shape_cast %131 : vector<16xf32> to vector<16x1xf32>
    %cst_42 = arith.constant 3.200000e+01 : f32
    %133 = vector.broadcast %cst_42 : f32 to vector<16x1xf32>
    %134 = arith.divf %132, %133 : vector<16x1xf32>
    %135 = vector.broadcast %134 : vector<16x1xf32> to vector<16x32xf32>
    %136 = arith.subf %130, %135 : vector<16x32xf32>
    %137 = arith.mulf %136, %136 : vector<16x32xf32>
    %cst_43 = arith.constant dense<0.000000e+00> : vector<16xf32>
    %138 = vector.multi_reduction <add>, %137, %cst_43 [1] : vector<16x32xf32> to vector<16xf32>
    %139 = vector.shape_cast %138 : vector<16xf32> to vector<16x1xf32>
    %cst_44 = arith.constant 3.200000e+01 : f32
    %140 = vector.broadcast %cst_44 : f32 to vector<16x1xf32>
    %141 = arith.divf %139, %140 : vector<16x1xf32>
    %142 = vector.broadcast %134 : vector<16x1xf32> to vector<16x32xf32>
    %143 = arith.subf %130, %142 : vector<16x32xf32>
    %cst_45 = arith.constant 9.99999974E-6 : f32
    %144 = vector.broadcast %cst_45 : f32 to vector<16x1xf32>
    %145 = arith.addf %141, %144 : vector<16x1xf32>
    %146 = math.rsqrt %145 : vector<16x1xf32>
    %147 = vector.broadcast %146 : vector<16x1xf32> to vector<16x32xf32>
    %148 = arith.mulf %143, %147 : vector<16x32xf32>
    %149 = vector.broadcast %4 : vector<1x32xf32> to vector<16x32xf32>
    %150 = arith.mulf %148, %149 : vector<16x32xf32>
    %151 = vector.broadcast %5 : vector<1x32xf32> to vector<16x32xf32>
    %152 = arith.addf %150, %151 : vector<16x32xf32>
    %153 = arith.truncf %152 : vector<16x32xf32> to vector<16x32xbf16>
    %c0_46 = arith.constant 0 : index
    %c0_47 = arith.constant 0 : index
    %154 = vector.load %arg6[%c0_46, %c0_47] : memref<32x32xbf16, #tpu.memory_space<vmem>>, vector<32x32xbf16>
    %cst_48 = arith.constant dense<0.000000e+00> : vector<16x32xf32>
    %155 = tpu.matmul %153, %154, %cst_48 {dimension_numbers = #tpu.dot_dimension_numbers<[1], [0], [0], [1], [0, 0, 1, 1], [], []>} : vector<16x32xbf16>, vector<32x32xbf16>, vector<16x32xf32> -> vector<16x32xf32>
    %c4 = arith.constant 4 : index
    %c0_49 = arith.constant 0 : index
    %156 = vector.load %arg3[%c4, %c0_49] : memref<6x32xf32, #tpu.memory_space<vmem>>, vector<1x32xf32>
    %157 = vector.broadcast %156 : vector<1x32xf32> to vector<16x32xf32>
    %158 = arith.addf %155, %157 : vector<16x32xf32>
    %159 = arith.mulf %158, %158 : vector<16x32xf32>
    %160 = arith.mulf %158, %159 : vector<16x32xf32>
    %cst_50 = arith.constant 4.471500e-02 : f32
    %161 = vector.broadcast %cst_50 : f32 to vector<16x32xf32>
    %162 = arith.mulf %161, %160 : vector<16x32xf32>
    %163 = arith.addf %158, %162 : vector<16x32xf32>
    %cst_51 = arith.constant 0.797884583 : f32
    %164 = vector.broadcast %cst_51 : f32 to vector<16x32xf32>
    %165 = arith.mulf %164, %163 : vector<16x32xf32>
    %166 = math.tanh %165 : vector<16x32xf32>
    %cst_52 = arith.constant 1.000000e+00 : f32
    %167 = vector.broadcast %cst_52 : f32 to vector<16x32xf32>
    %168 = arith.addf %167, %166 : vector<16x32xf32>
    %cst_53 = arith.constant 5.000000e-01 : f32
    %169 = vector.broadcast %cst_53 : f32 to vector<16x32xf32>
    %170 = arith.mulf %169, %168 : vector<16x32xf32>
    %171 = arith.mulf %158, %170 : vector<16x32xf32>
    %172 = arith.truncf %171 : vector<16x32xf32> to vector<16x32xbf16>
    %c0_54 = arith.constant 0 : index
    %c0_55 = arith.constant 0 : index
    %173 = vector.load %arg7[%c0_54, %c0_55] : memref<32x32xbf16, #tpu.memory_space<vmem>>, vector<32x32xbf16>
    %cst_56 = arith.constant dense<0.000000e+00> : vector<16x32xf32>
    %174 = tpu.matmul %172, %173, %cst_56 {dimension_numbers = #tpu.dot_dimension_numbers<[1], [0], [0], [1], [0, 0, 1, 1], [], []>} : vector<16x32xbf16>, vector<32x32xbf16>, vector<16x32xf32> -> vector<16x32xf32>
    %c5 = arith.constant 5 : index
    %c0_57 = arith.constant 0 : index
    %175 = vector.load %arg3[%c5, %c0_57] : memref<6x32xf32, #tpu.memory_space<vmem>>, vector<1x32xf32>
    %176 = vector.broadcast %175 : vector<1x32xf32> to vector<16x32xf32>
    %177 = arith.addf %174, %176 : vector<16x32xf32>
    %178 = arith.addf %130, %177 : vector<16x32xf32>
    %179 = vector.shape_cast %178 : vector<16x32xf32> to vector<2x8x32xf32>
    %c0_58 = arith.constant 0 : index
    %c0_59 = arith.constant 0 : index
    %c0_60 = arith.constant 0 : index
    %180 = vector.load %arg8[%c0_58, %c0_59, %c0_60] : memref<2x8x32xf32, #tpu.memory_space<vmem>>, vector<2x8x32xf32>
    tpu.vector_store %arg8[%c0_58, %c0_59, %c0_60], %179 {strides = array<i32>} : memref<2x8x32xf32, #tpu.memory_space<vmem>>, vector<2x8x32xf32>,
    return
  }
  func.func @transform_0(%arg0: i32) -> (i32, i32, i32) {
    %c0_i32 = arith.constant 0 : i32
    %c0_i32_0 = arith.constant 0 : i32
    %c0_i32_1 = arith.constant 0 : i32
    return %arg0, %c0_i32, %c0_i32_0 : i32, i32, i32
  }
  func.func @transform_1(%arg0: i32) -> (i32, i32) {
    %c0_i32 = arith.constant 0 : i32
    %c0_i32_0 = arith.constant 0 : i32
    %c0_i32_1 = arith.constant 0 : i32
    return %c0_i32, %c0_i32_0 : i32, i32
  }
  func.func @transform_2(%arg0: i32) -> (i32, i32) {
    %c0_i32 = arith.constant 0 : i32
    %c0_i32_0 = arith.constant 0 : i32
    %c0_i32_1 = arith.constant 0 : i32
    return %c0_i32, %c0_i32_0 : i32, i32
  }
  func.func @transform_3(%arg0: i32) -> (i32, i32) {
    %c0_i32 = arith.constant 0 : i32
    %c0_i32_0 = arith.constant 0 : i32
    %c0_i32_1 = arith.constant 0 : i32
    return %c0_i32, %c0_i32_0 : i32, i32
  }
  func.func @transform_4(%arg0: i32) -> (i32, i32) {
    %c0_i32 = arith.constant 0 : i32
    %c0_i32_0 = arith.constant 0 : i32
    %c0_i32_1 = arith.constant 0 : i32
    return %c0_i32, %c0_i32_0 : i32, i32
  }
  func.func @transform_5(%arg0: i32) -> (i32, i32) {
    %c0_i32 = arith.constant 0 : i32
    %c0_i32_0 = arith.constant 0 : i32
    %c0_i32_1 = arith.constant 0 : i32
    return %c0_i32, %c0_i32_0 : i32, i32
  }
  func.func @transform_6(%arg0: i32) -> (i32, i32) {
    %c0_i32 = arith.constant 0 : i32
    %c0_i32_0 = arith.constant 0 : i32
    %c0_i32_1 = arith.constant 0 : i32
    return %c0_i32, %c0_i32_0 : i32, i32
  }
  func.func @transform_7(%arg0: i32) -> (i32, i32, i32) {
    %c0_i32 = arith.constant 0 : i32
    %c0_i32_0 = arith.constant 0 : i32
    %c0_i32_1 = arith.constant 0 : i32
    return %arg0, %c0_i32, %c0_i32_0 : i32, i32, i32
  }
}

</mosaic_0001>

<bundles_post_ra>
// kernel: tpu_custom_call.1
= control target key start
LH: loop header
LB: loop body
LE: loop exit
PB: predicated region body
PF: predicated region fallthrough
CT: control target
= control target key end

     0   :  { %12 = vsyncpa [#allocation3], 0  ;;  %s2243_s0 = inlined_call_operand.hbm [shape: f32[2,8,32], index: 0, kind: input, shape index: {}]   ;;  %s2244_s1 = inlined_call_operand.hbm [shape: f32[4,32], index: 1, kind: input, shape index: {}]   ;;  %s2245_s2 = inlined_call_operand.hbm [shape: f32[6,32], index: 2, kind: input, shape index: {}]   ;;  %s2246_s3 = inlined_call_operand.hbm [shape: bf16[32,96], index: 3, kind: input, shape index: {}]   ;;  %s2247_s4 = inlined_call_operand.hbm [shape: bf16[32,32], index: 4, kind: input, shape index: {}]   ;;  %s2248_s5 = inlined_call_operand.hbm [shape: bf16[32,32], index: 5, kind: input, shape index: {}]   ;;  %s2249_s6 = inlined_call_operand.hbm [shape: bf16[32,32], index: 6, kind: input, shape index: {}]   ;;  %s2250_s7 = inlined_call_operand.hbm [shape: f32[2,8,32], index: 7, kind: output, shape index: {}]  }
   0x1   :  { %13 = vsyncpa [#allocation6], 0 }
   0x2   :  { %14 = vsyncpa [#allocation9], 0 }
   0x3   :  { %15 = vsyncpa [#allocation12], 0 }
   0x4   :  { %16 = vsyncpa [#allocation4], 0  ;;  %s1931_s24 = smov [#allocation5]   ;;  %s1932_s26 = smov [#allocation8]  }
   0x5   :  { %s35_s25 = sshll.u32 %s1931_s24, 4  ;;  %s54_s27 = sshll.u32 %s1932_s26, 4  ;;  %s36_s25 = int_to_ptr.vmem [resolvable:$true] %s35_s25  ;;  %s55_s27 = int_to_ptr.vmem [resolvable:$true] %s54_s27 }
   0x6   :  { %s1769_s28 = scalar_lea.vmem %s36_s25, 64  ;;  %p1774_p1 = scmp.lt.s32.totalorder %s36_s25, %s36_s25 }
   0x7   :  { %p1770_p0 = scmp.ne.s32.totalorder %s36_s25, %s1769_s28  ;;  %p1775_p2 = scmp.lt.s32.totalorder %s1769_s28, %s1769_s28 }
   0x9   :  { %p1776_p3 = por %p1775_p2, %p1774_p1 }
   0xb   :  { %p1777_p4 = pnand %p1776_p3, %p1770_p0 }
   0xd   :  { %1780 = shalt.err (!%p1777_p4)
}
   0xe   :  { %38 = dma.hbm_to_vmem [thread:$0]  %s2244_s1, 64, %s36_s25, [#allocation6]  }
   0xf   :  { %s1789_s8 = scalar_lea.vmem %s55_s27, 256  ;;  %p1794_p6 = scmp.lt.s32.totalorder %s55_s27, %s55_s27 }
  0x10   :  { %p1790_p5 = scmp.ne.s32.totalorder %s55_s27, %s1789_s8  ;;  %p1795_p7 = scmp.lt.s32.totalorder %s1789_s8, %s1789_s8 }
  0x12   :  { %p1796_p8 = por %p1795_p7, %p1794_p6 }
  0x14   :  { %p1797_p9 = pnand %p1796_p8, %p1790_p5 }
  0x16   :  { %1800 = shalt.err (!%p1797_p9)
}
  0x17   :  { %s1933_s9 = smov 64   ;;  %s1934_s10 = smov 4  }
  0x18   :  { %60 = dma.hbm_to_vmem [thread:$0]  %s2246_s3, 256, %s55_s27, [#allocation9], %s1933_s9, %s1933_s9, %s1934_s10  }
  0x19   :  { %s1935_s13 = smov [#allocation11]   ;;  %s1936_s15 = smov [#allocation2]  }
  0x1a   :  { %s78_s14 = sshll.u32 %s1935_s13, 4  ;;  %s22_s1 = sshll.u32 %s1936_s15, 4  ;;  %s79_s14 = int_to_ptr.vmem [resolvable:$true] %s78_s14  ;;  %s23_s1 = int_to_ptr.vmem [resolvable:$true] %s22_s1 }
  0x1b   :  { %s1809_s16 = scalar_lea.vmem %s79_s14, 256  ;;  %p1814_p11 = scmp.lt.s32.totalorder %s79_s14, %s79_s14 }
  0x1c   :  { %p1810_p10 = scmp.ne.s32.totalorder %s79_s14, %s1809_s16  ;;  %p1815_p12 = scmp.lt.s32.totalorder %s1809_s16, %s1809_s16 }
  0x1e   :  { %p1816_p13 = por %p1815_p12, %p1814_p11 }
  0x20   :  { %p1817_p0 = pnand %p1816_p13, %p1810_p10 }
  0x22   :  { %1820 = shalt.err (!%p1817_p0)
}
  0x23   :  { %84 = dma.hbm_to_vmem [thread:$0]  %s2248_s5, 256, %s79_s14, [#allocation12], %s1933_s9, %s1933_s9, %s1934_s10  }
  0x24   :  { %s1829_s3 = scalar_lea.vmem %s23_s1, 256  ;;  %p1834_p2 = scmp.lt.s32.totalorder %s23_s1, %s23_s1 }
  0x25   :  { %p1830_p1 = scmp.ne.s32.totalorder %s23_s1, %s1829_s3  ;;  %p1835_p3 = scmp.lt.s32.totalorder %s1829_s3, %s1829_s3 }
  0x27   :  { %p1836_p4 = por %p1835_p3, %p1834_p2 }
  0x29   :  { %p1837_p5 = pnand %p1836_p4, %p1830_p1 }
  0x2b   :  { %1840 = shalt.err (!%p1837_p5)
}
  0x2c   :  { %s1937_s19 = smov 128   ;;  %s1938_s20 = smov 8  }
  0x2d   :  { %28 = dma.hbm_to_vmem [thread:$0]  %s2243_s0, 256, %s23_s1, [#allocation3], %s1937_s19, %s1937_s19, %s1938_s20  }
  0x2e   :  { %s1939_s23 = smov [#allocation7]   ;;  %s1940_s25 = smov [#allocation10]  }
  0x2f   :  { %s45_s24 = sshll.u32 %s1939_s23, 4  ;;  %s66_s5 = sshll.u32 %s1940_s25, 4  ;;  %s46_s24 = int_to_ptr.vmem [resolvable:$true] %s45_s24  ;;  %s67_s5 = int_to_ptr.vmem [resolvable:$true] %s66_s5 }
  0x30   :  { %s1849_s26 = scalar_lea.vmem %s46_s24, 128  ;;  %p1854_p7 = scmp.lt.s32.totalorder %s46_s24, %s46_s24 }
  0x31   :  { %p1850_p6 = scmp.ne.s32.totalorder %s46_s24, %s1849_s26  ;;  %p1855_p8 = scmp.lt.s32.totalorder %s1849_s26, %s1849_s26 }
  0x33   :  { %p1856_p9 = por %p1855_p8, %p1854_p7 }
  0x35   :  { %p1857_p10 = pnand %p1856_p9, %p1850_p6 }
  0x37   :  { %1860 = shalt.err (!%p1857_p10)
}
  0x38   :  { %48 = dma.hbm_to_vmem [thread:$0]  %s2245_s2, 128, %s46_s24, [#allocation6]  }
  0x39   :  { %s1869_s29 = scalar_lea.vmem %s67_s5, 256  ;;  %p1874_p12 = scmp.lt.s32.totalorder %s67_s5, %s67_s5 }
  0x3a   :  { %p1870_p11 = scmp.ne.s32.totalorder %s67_s5, %s1869_s29  ;;  %p1875_p13 = scmp.lt.s32.totalorder %s1869_s29, %s1869_s29 }
  0x3c   :  { %p1876_p0 = por %p1875_p13, %p1874_p12 }
  0x3e   :  { %p1877_p1 = pnand %p1876_p0, %p1870_p11 }
  0x40   :  { %1880 = shalt.err (!%p1877_p1)
}
  0x41   :  { %72 = dma.hbm_to_vmem [thread:$0]  %s2247_s4, 256, %s67_s5, [#allocation9], %s1933_s9, %s1933_s9, %s1934_s10  }
  0x42   :  { %s1941_s8 = smov [#allocation13]  }
  0x43   :  { %s90_s11 = sshll.u32 %s1941_s8, 4  ;;  %s91_s11 = int_to_ptr.vmem [resolvable:$true] %s90_s11 }
  0x44   :  { %s1889_s12 = scalar_lea.vmem %s91_s11, 256  ;;  %p1894_p3 = scmp.lt.s32.totalorder %s91_s11, %s91_s11 }
  0x45   :  { %p1890_p2 = scmp.ne.s32.totalorder %s91_s11, %s1889_s12  ;;  %p1895_p4 = scmp.lt.s32.totalorder %s1889_s12, %s1889_s12 }
  0x47   :  { %p1896_p5 = por %p1895_p4, %p1894_p3 }
  0x49   :  { %p1897_p6 = pnand %p1896_p5, %p1890_p2 }
  0x4b   :  { %1900 = shalt.err (!%p1897_p6)
}
  0x4c   :  { %96 = dma.hbm_to_vmem [thread:$0]  %s2249_s6, 256, %s91_s11, [#allocation12], %s1933_s9, %s1933_s9, %s1934_s10  }
  0x4d   :  { %1921 = dma.done.wait [#allocation3], 256  }
  0x4e   :  { %1922 = vsyncadd [#allocation3], 4294967040 }
  0x4f   :  { %1923 = dma.done.wait [#allocation6], 192  }
  0x50   :  { %1924 = vsyncadd [#allocation6], 4294967104 }
  0x51   :  { %1925 = dma.done.wait [#allocation9], 512  }
  0x52   :  { %1926 = vsyncadd [#allocation9], 4294966784 }
  0x53   :  { %1927 = dma.done.wait [#allocation12], 512  }
  0x54   :  { %1928 = vsyncadd [#allocation12], 4294966784  ;;  %vm125_vm0 = vcmask 261120   ;;  %v2034_v0 = vld [vmem:[#allocation2] sm:$0xff]  ;;  %v2036_v1 = vld [vmem:[#allocation2 + $0x8] sm:$0xff]  ;;  %v1942_v15 = vmov 0.0  }
  0x55   :  { %v126_v2 = vsel %vm125_vm0, %v2034_v0, 0.0  ;;  %v129_v3 = vsel %vm125_vm0, %v2036_v1, 0.0  ;;  %v1709_v14 = vld [vmem:[#allocation8 + $0x8] sm:$0xff]   ;;  %1539 = vmatprep.subr.bf16.mxu0 %v1942_v15  ;;  %vm1943_vm1 = vmmov 0   ;;  %v1710_v16 = vld [vmem:[#allocation8] sm:$0xff]   ;;  %1547 = vmatprep.subr.bf16.mxu1 %v1942_v15  ;;  %s1944_s4 = smov 32  }
  0x56   :  { %127 = vadd.xlane.f32.xlu0 %v126_v2  ;;  %1543 = vmatprep.mubr.msk.bf16.mxu0 %vm1943_vm1, %v1942_v15  ;;  %v1463_v17 = vld [vmem:[#allocation7 + $0x1] ss:$0 sm:$0xff]  ;;  %v1457_v26 = vld [vmem:[#allocation5] ss:$0 sm:$0xff]  ;;  %v1458_v30 = vld [vmem:[#allocation5 + $0x1] ss:$0 sm:$0xff] }
  0x57   :  { %1540 = vmatpush3.bf16.msra.mxu0 %v1709_v14  ;;  %1549 = vmatprep.mubr.msk.bf16.mxu1 %vm1943_vm1, %v1942_v15  ;;  %s1945_s6 = smov 96   ;;  %vm264_vm2 = vcmask 64512   ;;  %v1462_v44 = vld [vmem:[#allocation7] ss:$0 sm:$0xff]  ;;  %v1464_v63 = vld [vmem:[#allocation7 + $0x2] ss:$0 sm:$0xff] }
  0x58   :  { %1541 = vmatprep.subr.bf16.mxu0 %v1942_v15  ;;  %s1946_s10 = smov 88   ;;  %s1947_s14 = smov 120   ;;  %vm390_vm3 = vcmask 1043456   ;;  %vm1171_vm4 = vcmask 130048   ;;  %vm1174_vm5 = vcmask 195584  }
  0x59   :  { %s1949_s15 = smov 80   ;;  %s1950_s1 = smov 112  }
  0x5a   :  { %130 = vadd.xlane.f32.xlu0 %v129_v3  ;;  %s1951_s16 = smov 48   ;;  %s1952_s17 = smov 72  }
  0x5b   :  { %1542 = vmatpush3.bf16.msra.mxu0 %v1710_v16  ;;  %s1953_s18 = smov 104   ;;  %s1954_s3 = smov 40  }
  0x5c   :  { %1553 = vmatprep.subr.bf16.mxu0 %v1942_v15  ;;  %s1955_s21 = smov 16   ;;  %s1956_s22 = smov 24  }
  0x5d   :  { %s1957_s23 = smov [#allocation14]  }
  0x5e   :  { %s1442_s24 = sshll.u32 %s1957_s23, 4  ;;  %s1443_s24 = int_to_ptr.vmem [resolvable:$true] %s1442_s24 }
  0x5f   :  { %s1901_s25 = scalar_lea.vmem %s1443_s24, 256  ;;  %p1906_p8 = scmp.lt.s32.totalorder %s1443_s24, %s1443_s24 }
  0x60   :  { %p1902_p7 = scmp.ne.s32.totalorder %s1443_s24, %s1901_s25  ;;  %p1907_p9 = scmp.lt.s32.totalorder %s1901_s25, %s1901_s25 }
  0x62   :  { %p1908_p10 = por %p1907_p9, %p1906_p8 }
  0x64   :  { %p1909_p11 = pnand %p1908_p10, %p1902_p7 }
  0x70   :  { %239 = vrot.lane.b32.xlu0 %v1463_v17, %s1944_s4 }
  0xdf   :  { %v128_v4 = vpop.xlane.xlu0 %127 }
  0xe0   :  { %v133_v5 = vmul.f32 0.03125, %v128_v4 }
  0xe2   :  { %v135_v6 = vsub.f32 %v2034_v0, %v133_v5 }
  0xe3   :  { %v131_v7 = vpop.xlane.xlu0 %130 }
  0xe4   :  { %v134_v8 = vmul.f32 0.03125, %v131_v7  ;;  %v137_v9 = vmul.f32 %v135_v6, %v135_v6 }
  0xe6   :  { %v136_v10 = vsub.f32 %v2036_v1, %v134_v8  ;;  %v139_v11 = vsel %vm125_vm0, %v137_v9, 0.0 }
  0xe7   :  { %140 = vadd.xlane.f32.xlu1 %v139_v11  ;;  %v240_v35 = vpop.permute.xlu0 %239 }
  0xe8   :  { %v138_v12 = vmul.f32 %v136_v10, %v136_v10 }
  0xea   :  { %v142_v13 = vsel %vm125_vm0, %v138_v12, 0.0 }
  0xeb   :  { %143 = vadd.xlane.f32.xlu1 %v142_v13 }
 0x170   :  { %v141_v18 = vpop.xlane.xlu1 %140 }
 0x171   :  { %v145_v19 = vmul.f32 0.03125, %v141_v18 }
 0x173   :  { %v147_v20 = vadd.f32 1e-05, %v145_v19 }
 0x174   :  { %v144_v21 = vpop.xlane.xlu1 %143 }
 0x175   :  { %1717 = vrsqrt.f32 %v147_v20  ;;  %v146_v22 = vmul.f32 0.03125, %v144_v21 }
 0x177   :  { %v148_v23 = vadd.f32 1e-05, %v146_v22 }
 0x179   :  { %1719 = vrsqrt.f32 %v148_v23 }
 0x182   :  { %v1718_v24 = vpop.eup %1717 }
 0x183   :  { %v151_v25 = vmul.f32 %v1718_v24, %v135_v6 }
 0x185   :  { %v157_v29 = vmul.f32 %v1457_v26, %v151_v25 }
 0x186   :  { %v1720_v27 = vpop.eup %1719 }
 0x187   :  { %v152_v28 = vmul.f32 %v1720_v27, %v136_v10  ;;  %v163_v32 = vadd.f32 %v1458_v30, %v157_v29 }
 0x189   :  { %v158_v31 = vmul.f32 %v1457_v26, %v152_v28 }
 0x18b   :  { %v164_v33 = vadd.f32 %v1458_v30, %v158_v31 }
 0x18d   :  { %v165_v34 = vpack.c.bf16 %v164_v33, %v163_v32 }
 0x18f   :  { %1544 = vmatmul.mubr.msk.bf16.vlgmr.msra.gmra.mxu0 %vm125_vm0, %v165_v34 }
 0x190   :  { %1555 = vmatprep.mubr.msk.bf16.mxu0 %vm1943_vm1, %v1942_v15 }
 0x24f   :  { %v219_v36 = vpop.f32.mrf.mxu0 }
 0x250   :  { %v242_v37 = vadd.f32 %v240_v35, %v219_v36  ;;  %v231_v47 = vadd.f32 %v1462_v44, %v219_v36 }
 0x251   :  { %v1545_v38 = vpop.f32.mrf.mxu0 }
 0x252   :  { %v2057_v39 = vpack.c.bf16 %v242_v37, %v242_v37  ;;  %v2066_v50 = vpack.c.bf16 %v231_v47, %v231_v47 }
 0x253   :  { %v222_v40 = vpop.f32.mrf.mxu0 }
 0x254   :  { %v243_v41 = vadd.f32 %v240_v35, %v222_v40  ;;  %262 = vrot.lane.b32.xlu1 %v2057_v39, %s1945_s6  ;;  %v232_v51 = vadd.f32 %v1462_v44, %v222_v40 }
 0x255   :  { %v1546_v42 = vpop.f32.mrf.mxu0 }
 0x256   :  { %v2060_v43 = vpack.c.bf16 %v243_v41, %v243_v41  ;;  %v2073_v52 = vpack.c.bf16 %v232_v51, %v232_v51 }
 0x258   :  { %312 = vrot.lane.b32.xlu1 %v2060_v43, %s1945_s6 }
 0x2c6   :  { %v263_v45 = vpop.permute.xlu1 %262 }
 0x2c7   :  { %v269_v46 = vsel %vm264_vm2, %v263_v45, 0 }
 0x2c8   :  { %1548 = vmatpush3.bf16.xpose.msra.mxu1 %v269_v46 }
 0x2c9   :  { %1559 = vmatprep.subr.bf16.mxu1 %v1942_v15 }
 0x2ca   :  { %v313_v48 = vpop.permute.xlu1 %312 }
 0x2cb   :  { %v318_v49 = vsel %vm264_vm2, %v313_v48, 0 }
 0x2cc   :  { %1554 = vmatpush3.bf16.xpose.msra.mxu0 %v318_v49 }
 0x2cd   :  { %1565 = vmatprep.subr.bf16.mxu0 %v1942_v15 }
 0x2cf   :  { %1550 = vmatmul.mubr.msk.bf16.vlgmr.msra.gmra.mxu1 %vm264_vm2, %v2066_v50 }
 0x2d0   :  { %1561 = vmatprep.mubr.msk.bf16.mxu1 %vm1943_vm1, %v1942_v15 }
 0x2d3   :  { %1556 = vmatmul.mubr.msk.bf16.vlgmr.msra.gmra.mxu0 %vm264_vm2, %v2073_v52 }
 0x2d4   :  { %1567 = vmatprep.mubr.msk.bf16.mxu0 %vm1943_vm1, %v1942_v15 }
 0x38f   :  { %v305_v53 = vpop.f32.mrf.mxu1 }
 0x390   :  { %v360_v54 = vsel %vm264_vm2, %v305_v53, -inf }
 0x391   :  { %361 = vmax.xlane.f32.xlu1 %v360_v54  ;;  %v1551_v55 = vpop.f32.mrf.mxu1 }
 0x393   :  { %v308_v56 = vpop.f32.mrf.mxu1  ;;  %v354_v57 = vpop.f32.mrf.mxu0 }
 0x394   :  { %v363_v58 = vsel %vm264_vm2, %v354_v57, -inf }
 0x395   :  { %v1552_v59 = vpop.f32.mrf.mxu1  ;;  %364 = vmax.xlane.f32.xlu0 %v363_v58  ;;  %v1557_v60 = vpop.f32.mrf.mxu0 }
 0x397   :  { %v357_v61 = vpop.f32.mrf.mxu0 }
 0x399   :  { %v1558_v62 = vpop.f32.mrf.mxu0 }
 0x3ab   :  { %250 = vrot.lane.b32.xlu0 %v1464_v63, %s1933_s9 }
 0x41a   :  { %v362_v8 = vpop.xlane.xlu1 %361 }
 0x41b   :  { %v366_v9 = vsub.f32 %v305_v53, %v362_v8 }
 0x41d   :  { %v368_v10 = vmul.f32 1.442695, %v366_v9 }
 0x41e   :  { %v365_v2 = vpop.xlane.xlu0 %364 }
 0x41f   :  { %v367_v11 = vsub.f32 %v354_v57, %v365_v2  ;;  %1721 = vpow2.f32 %v368_v10 }
 0x421   :  { %v370_v12 = vmul.f32 1.442695, %v367_v11 }
 0x422   :  { %v251_v3 = vpop.permute.xlu0 %250 }
 0x423   :  { %v253_v4 = vadd.f32 %v251_v3, %v219_v36  ;;  %v254_v5 = vadd.f32 %v251_v3, %v222_v40  ;;  %1723 = vpow2.f32 %v370_v12 }
 0x425   :  { %v2082_v6 = vpack.c.bf16 %v253_v4, %v253_v4  ;;  %v2084_v7 = vpack.c.bf16 %v254_v5, %v254_v5 }
 0x427   :  { %435 = vrot.lane.b32.xlu0 %v2084_v7, %s1933_s9  ;;  %385 = vrot.lane.b32.xlu1 %v2082_v6, %s1933_s9  ;;  %s1948_s9 = smov 56  }
 0x42b   :  { %486 = vrot.lane.b32.xlu0 %v2057_v39, %s1946_s10 }
 0x42c   :  { %v1722_v13 = vpop.eup %1721 }
 0x42d   :  { %v372_v14 = vsel %vm264_vm2, %v1722_v13, 0.0 }
 0x42f   :  { %484 = vrot.lane.b32.xlu0 %v2066_v50, %s1947_s14 }
 0x430   :  { %v1724_v16 = vpop.eup %1723 }
 0x431   :  { %v375_v17 = vsel %vm264_vm2, %v1724_v16, 0.0 }
 0x44b   :  { %373 = vadd.xlane.f32.xlu1 %v372_v14 }
 0x44f   :  { %376 = vadd.xlane.f32.xlu1 %v375_v17 }
 0x460   :  { %537 = vrot.lane.b32.xlu1 %v2060_v43, %s1946_s10 }
 0x464   :  { %535 = vrot.lane.b32.xlu1 %v2073_v52, %s1947_s14 }
 0x499   :  { %v436_v18 = vpop.permute.xlu0 %435  ;;  %v386_v19 = vpop.permute.xlu1 %385 }
 0x49a   :  { %v441_v20 = vsel %vm390_vm3, %v436_v18, 0  ;;  %v392_v21 = vsel %vm390_vm3, %v386_v19, 0 }
 0x49b   :  { %1560 = vmatpush3.bf16.msra.mxu1 %v392_v21  ;;  %1566 = vmatpush3.bf16.msra.mxu0 %v441_v20 }
 0x49c   :  { %1571 = vmatprep.subr.bf16.mxu1 %v1942_v15  ;;  %1577 = vmatprep.subr.bf16.mxu0 %v1942_v15 }
 0x49d   :  { %v487_v26 = vpop.permute.xlu0 %486 }
 0x49e   :  { %v492_v29 = vsel %vm264_vm2, %v487_v26, 0 }
 0x4a1   :  { %v485_v34 = vpop.permute.xlu0 %484 }
 0x4d4   :  { %v374_v22 = vpop.xlane.xlu1 %373 }
 0x4d5   :  { %1725 = vrcp.f32 %v374_v22 }
 0x4d8   :  { %v377_v23 = vpop.xlane.xlu1 %376 }
 0x4d9   :  { %1727 = vrcp.f32 %v377_v23 }
 0x4dc   :  { %v538_v31 = vpop.permute.xlu1 %537 }
 0x4dd   :  { %v543_v33 = vsel %vm264_vm2, %v538_v31, 0 }
 0x4e0   :  { %v536_v35 = vpop.permute.xlu1 %535 }
 0x4e2   :  { %v1726_v24 = vpop.eup %1725 }
 0x4e3   :  { %v380_v25 = vmul.f32 %v1726_v24, %v1722_v13 }
 0x4e5   :  { %v382_v27 = vpack.c.bf16 %v380_v25, %v380_v25 }
 0x4e6   :  { %v1728_v28 = vpop.eup %1727 }
 0x4e7   :  { %1562 = vmatmul.mubr.msk.bf16.vlgmr.msra.gmra.mxu1 %vm264_vm2, %v382_v27  ;;  %v381_v30 = vmul.f32 %v1728_v28, %v1724_v16 }
 0x4e8   :  { %1572 = vmatpush3.bf16.xpose.msra.mxu1 %v492_v29  ;;  %1573 = vmatprep.mubr.msk.bf16.mxu1 %vm1943_vm1, %v1942_v15 }
 0x4e9   :  { %v383_v32 = vpack.c.bf16 %v381_v30, %v381_v30  ;;  %1583 = vmatprep.subr.bf16.mxu1 %v1942_v15 }
 0x4eb   :  { %1568 = vmatmul.mubr.msk.bf16.vlgmr.msra.gmra.mxu0 %vm264_vm2, %v383_v32 }
 0x4ec   :  { %1578 = vmatpush3.bf16.xpose.msra.mxu0 %v543_v33  ;;  %1579 = vmatprep.mubr.msk.bf16.mxu0 %vm1943_vm1, %v1942_v15 }
 0x4ed   :  { %1589 = vmatprep.subr.bf16.mxu0 %v1942_v15 }
 0x4ef   :  { %1574 = vmatmul.mubr.msk.bf16.vlgmr.msra.gmra.mxu1 %vm264_vm2, %v485_v34 }
 0x4f0   :  { %1585 = vmatprep.mubr.msk.bf16.mxu1 %vm1943_vm1, %v1942_v15 }
 0x4f3   :  { %1580 = vmatmul.mubr.msk.bf16.vlgmr.msra.gmra.mxu0 %vm264_vm2, %v536_v35 }
 0x4f4   :  { %1591 = vmatprep.mubr.msk.bf16.mxu0 %vm1943_vm1, %v1942_v15 }
 0x5a7   :  { %v2116_v36 = vpop.f32.mrf.mxu1 }
 0x5a9   :  { %v1563_v37 = vpop.f32.mrf.mxu1 }
 0x5ab   :  { %v431_v38 = vpop.f32.mrf.mxu1  ;;  %v2118_v40 = vpop.f32.mrf.mxu0 }
 0x5ad   :  { %v1564_v41 = vpop.f32.mrf.mxu1  ;;  %v1569_v42 = vpop.f32.mrf.mxu0 }
 0x5af   :  { %v480_v44 = vpop.f32.mrf.mxu0  ;;  %v528_v45 = vpop.f32.mrf.mxu1 }
 0x5b0   :  { %v585_v46 = vsel %vm264_vm2, %v528_v45, -inf }
 0x5b1   :  { %586 = vmax.xlane.f32.xlu0 %v585_v46  ;;  %v1570_v47 = vpop.f32.mrf.mxu0  ;;  %v1575_v48 = vpop.f32.mrf.mxu1 }
 0x5b3   :  { %v531_v49 = vpop.f32.mrf.mxu1  ;;  %v579_v51 = vpop.f32.mrf.mxu0 }
 0x5b4   :  { %v588_v53 = vsel %vm264_vm2, %v579_v51, -inf }
 0x5b5   :  { %v1576_v54 = vpop.f32.mrf.mxu1  ;;  %589 = vmax.xlane.f32.xlu1 %v588_v53  ;;  %v1581_v55 = vpop.f32.mrf.mxu0 }
 0x5b7   :  { %v582_v56 = vpop.f32.mrf.mxu0 }
 0x5b9   :  { %v1582_v57 = vpop.f32.mrf.mxu0 }
 0x5c6   :  { %657 = vrot.lane.b32.xlu1 %v2084_v7, %s1948_s9 }
 0x5ca   :  { %707 = vrot.lane.b32.xlu1 %v2057_v39, %s1949_s15 }
 0x5ce   :  { %757 = vrot.lane.b32.xlu1 %v2060_v43, %s1949_s15 }
 0x5d2   :  { %755 = vrot.lane.b32.xlu1 %v2073_v52, %s1950_s1 }
 0x63a   :  { %v587_v58 = vpop.xlane.xlu0 %586 }
 0x63b   :  { %v591_v59 = vsub.f32 %v528_v45, %v587_v58 }
 0x63d   :  { %v593_v60 = vmul.f32 1.442695, %v591_v59 }
 0x63e   :  { %v590_v61 = vpop.xlane.xlu1 %589 }
 0x63f   :  { %1729 = vpow2.f32 %v593_v60  ;;  %v592_v62 = vsub.f32 %v579_v51, %v590_v61 }
 0x641   :  { %v595_v63 = vmul.f32 1.442695, %v592_v62 }
 0x642   :  { %v658_v2 = vpop.permute.xlu1 %657 }
 0x643   :  { %1731 = vpow2.f32 %v595_v63  ;;  %v663_v3 = vsel %vm390_vm3, %v658_v2, 0 }
 0x644   :  { %1590 = vmatpush3.bf16.msra.mxu0 %v663_v3 }
 0x645   :  { %1601 = vmatprep.subr.bf16.mxu0 %v1942_v15 }
 0x646   :  { %v708_v16 = vpop.permute.xlu1 %707 }
 0x647   :  { %v713_v20 = vsel %vm264_vm2, %v708_v16, 0 }
 0x64a   :  { %v758_v22 = vpop.permute.xlu1 %757 }
 0x64b   :  { %v763_v24 = vsel %vm264_vm2, %v758_v22, 0 }
 0x64c   :  { %v1730_v4 = vpop.eup %1729 }
 0x64d   :  { %v597_v5 = vsel %vm264_vm2, %v1730_v4, 0.0 }
 0x64e   :  { %598 = vadd.xlane.f32.xlu0 %v597_v5  ;;  %v756_v26 = vpop.permute.xlu1 %755 }
 0x650   :  { %v1732_v8 = vpop.eup %1731 }
 0x651   :  { %v600_v9 = vsel %vm264_vm2, %v1732_v8, 0.0 }
 0x652   :  { %601 = vadd.xlane.f32.xlu0 %v600_v9 }
 0x668   :  { %609 = vrot.lane.b32.xlu0 %v2082_v6, %s1948_s9 }
 0x66c   :  { %705 = vrot.lane.b32.xlu0 %v2066_v50, %s1950_s1 }
 0x6d7   :  { %v599_v10 = vpop.xlane.xlu0 %598 }
 0x6d8   :  { %1733 = vrcp.f32 %v599_v10 }
 0x6db   :  { %v602_v11 = vpop.xlane.xlu0 %601 }
 0x6dc   :  { %1735 = vrcp.f32 %v602_v11 }
 0x6df   :  { %v610_v12 = vpop.permute.xlu0 %609 }
 0x6e0   :  { %v615_v13 = vsel %vm390_vm3, %v610_v12, 0 }
 0x6e1   :  { %1584 = vmatpush3.bf16.msra.mxu1 %v615_v13 }
 0x6e2   :  { %1595 = vmatprep.subr.bf16.mxu1 %v1942_v15 }
 0x6e3   :  { %v706_v25 = vpop.permute.xlu0 %705 }
 0x6e5   :  { %v1734_v14 = vpop.eup %1733 }
 0x6e6   :  { %v605_v17 = vmul.f32 %v1734_v14, %v1730_v4 }
 0x6e8   :  { %v607_v18 = vpack.c.bf16 %v605_v17, %v605_v17 }
 0x6e9   :  { %v1736_v19 = vpop.eup %1735 }
 0x6ea   :  { %1586 = vmatmul.mubr.msk.bf16.vlgmr.msra.gmra.mxu1 %vm264_vm2, %v607_v18  ;;  %v606_v21 = vmul.f32 %v1736_v19, %v1732_v8 }
 0x6eb   :  { %1596 = vmatpush3.bf16.xpose.msra.mxu1 %v713_v20  ;;  %1597 = vmatprep.mubr.msk.bf16.mxu1 %vm1943_vm1, %v1942_v15 }
 0x6ec   :  { %v608_v23 = vpack.c.bf16 %v606_v21, %v606_v21  ;;  %1607 = vmatprep.subr.bf16.mxu1 %v1942_v15 }
 0x6ee   :  { %1592 = vmatmul.mubr.msk.bf16.vlgmr.msra.gmra.mxu0 %vm264_vm2, %v608_v23 }
 0x6ef   :  { %1602 = vmatpush3.bf16.xpose.msra.mxu0 %v763_v24  ;;  %1603 = vmatprep.mubr.msk.bf16.mxu0 %vm1943_vm1, %v1942_v15 }
 0x6f0   :  { %1613 = vmatprep.subr.bf16.mxu0 %v1942_v15 }
 0x6f2   :  { %1598 = vmatmul.mubr.msk.bf16.vlgmr.msra.gmra.mxu1 %vm264_vm2, %v706_v25 }
 0x6f3   :  { %1609 = vmatprep.mubr.msk.bf16.mxu1 %vm1943_vm1, %v1942_v15 }
 0x6f6   :  { %1604 = vmatmul.mubr.msk.bf16.vlgmr.msra.gmra.mxu0 %vm264_vm2, %v756_v26 }
 0x6f7   :  { %1615 = vmatprep.mubr.msk.bf16.mxu0 %vm1943_vm1, %v1942_v15 }
 0x7aa   :  { %v2150_v27 = vpop.f32.mrf.mxu1 }
 0x7ac   :  { %v1587_v28 = vpop.f32.mrf.mxu1 }
 0x7ae   :  { %v654_v29 = vpop.f32.mrf.mxu1  ;;  %v2152_v30 = vpop.f32.mrf.mxu0 }
 0x7af   :  { %v1694_v31 = vpack.i.bf16 %v2152_v30, %v2150_v27 }
 0x7b0   :  { %v1588_v32 = vpop.f32.mrf.mxu1  ;;  %v1593_v33 = vpop.f32.mrf.mxu0 }
 0x7b2   :  { %v702_v34 = vpop.f32.mrf.mxu0  ;;  %v749_v35 = vpop.f32.mrf.mxu1 }
 0x7b3   :  { %v805_v37 = vsel %vm264_vm2, %v749_v35, -inf }
 0x7b4   :  { %806 = vmax.xlane.f32.xlu0 %v805_v37  ;;  %v1594_v38 = vpop.f32.mrf.mxu0  ;;  %v1599_v41 = vpop.f32.mrf.mxu1 }
 0x7b6   :  { %v752_v42 = vpop.f32.mrf.mxu1  ;;  %v799_v44 = vpop.f32.mrf.mxu0 }
 0x7b7   :  { %v808_v45 = vsel %vm264_vm2, %v799_v44, -inf }
 0x7b8   :  { %v1600_v46 = vpop.f32.mrf.mxu1  ;;  %809 = vmax.xlane.f32.xlu1 %v808_v45  ;;  %v1605_v47 = vpop.f32.mrf.mxu0 }
 0x7ba   :  { %v802_v48 = vpop.f32.mrf.mxu0 }
 0x7bc   :  { %v1606_v49 = vpop.f32.mrf.mxu0 }
 0x7c9   :  { %877 = vrot.lane.b32.xlu1 %v2084_v7, %s1951_s16 }
 0x7cd   :  { %927 = vrot.lane.b32.xlu1 %v2057_v39, %s1952_s17 }
 0x7d1   :  { %977 = vrot.lane.b32.xlu1 %v2060_v43, %s1952_s17 }
 0x7d5   :  { %975 = vrot.lane.b32.xlu1 %v2073_v52, %s1953_s18 }
 0x83d   :  { %v807_v51 = vpop.xlane.xlu0 %806 }
 0x83e   :  { %v811_v53 = vsub.f32 %v749_v35, %v807_v51 }
 0x840   :  { %v813_v54 = vmul.f32 1.442695, %v811_v53 }
 0x841   :  { %v810_v55 = vpop.xlane.xlu1 %809 }
 0x842   :  { %1737 = vpow2.f32 %v813_v54  ;;  %v812_v56 = vsub.f32 %v799_v44, %v810_v55 }
 0x844   :  { %v815_v57 = vmul.f32 1.442695, %v812_v56 }
 0x845   :  { %v878_v58 = vpop.permute.xlu1 %877 }
 0x846   :  { %1739 = vpow2.f32 %v815_v57  ;;  %v883_v59 = vsel %vm390_vm3, %v878_v58, 0 }
 0x847   :  { %1614 = vmatpush3.bf16.msra.mxu0 %v883_v59 }
 0x848   :  { %1625 = vmatprep.subr.bf16.mxu0 %v1942_v15 }
 0x849   :  { %v928_v4 = vpop.permute.xlu1 %927 }
 0x84a   :  { %v933_v10 = vsel %vm264_vm2, %v928_v4, 0 }
 0x84d   :  { %v978_v11 = vpop.permute.xlu1 %977 }
 0x84e   :  { %v983_v13 = vsel %vm264_vm2, %v978_v11, 0 }
 0x84f   :  { %v1738_v39 = vpop.eup %1737 }
 0x850   :  { %v817_v43 = vsel %vm264_vm2, %v1738_v39, 0.0 }
 0x851   :  { %818 = vadd.xlane.f32.xlu0 %v817_v43  ;;  %v976_v16 = vpop.permute.xlu1 %975 }
 0x853   :  { %v1740_v60 = vpop.eup %1739 }
 0x854   :  { %v820_v52 = vsel %vm264_vm2, %v1740_v60, 0.0 }
 0x855   :  { %821 = vadd.xlane.f32.xlu0 %v820_v52  ;;  %v1712_v52 = vld [vmem:[#allocation10] sm:$0xff]  }
 0x86b   :  { %829 = vrot.lane.b32.xlu0 %v2082_v6, %s1951_s16 }
 0x86f   :  { %925 = vrot.lane.b32.xlu0 %v2066_v50, %s1953_s18 }
 0x8da   :  { %v819_v61 = vpop.xlane.xlu0 %818 }
 0x8db   :  { %1741 = vrcp.f32 %v819_v61 }
 0x8de   :  { %v822_v62 = vpop.xlane.xlu0 %821 }
 0x8df   :  { %1743 = vrcp.f32 %v822_v62 }
 0x8e2   :  { %v830_v63 = vpop.permute.xlu0 %829 }
 0x8e3   :  { %v835_v2 = vsel %vm390_vm3, %v830_v63, 0 }
 0x8e4   :  { %1608 = vmatpush3.bf16.msra.mxu1 %v835_v2 }
 0x8e5   :  { %1619 = vmatprep.subr.bf16.mxu1 %v1942_v15 }
 0x8e6   :  { %v926_v14 = vpop.permute.xlu0 %925 }
 0x8e8   :  { %v1742_v3 = vpop.eup %1741 }
 0x8e9   :  { %v825_v5 = vmul.f32 %v1742_v3, %v1738_v39 }
 0x8eb   :  { %v827_v8 = vpack.c.bf16 %v825_v5, %v825_v5 }
 0x8ec   :  { %v1744_v9 = vpop.eup %1743 }
 0x8ed   :  { %1610 = vmatmul.mubr.msk.bf16.vlgmr.msra.gmra.mxu1 %vm264_vm2, %v827_v8  ;;  %v826_v50 = vmul.f32 %v1744_v9, %v1740_v60  ;;  %v1711_v60 = vld [vmem:[#allocation10 + $0x8] sm:$0xff]  }
 0x8ee   :  { %1620 = vmatpush3.bf16.xpose.msra.mxu1 %v933_v10  ;;  %1621 = vmatprep.mubr.msk.bf16.mxu1 %vm1943_vm1, %v1942_v15 }
 0x8ef   :  { %v828_v12 = vpack.c.bf16 %v826_v50, %v826_v50  ;;  %1631 = vmatprep.subr.bf16.mxu1 %v1942_v15 }
 0x8f1   :  { %1616 = vmatmul.mubr.msk.bf16.vlgmr.msra.gmra.mxu0 %vm264_vm2, %v828_v12 }
 0x8f2   :  { %1626 = vmatpush3.bf16.xpose.msra.mxu0 %v983_v13  ;;  %1627 = vmatprep.mubr.msk.bf16.mxu0 %vm1943_vm1, %v1942_v15 }
 0x8f3   :  { %1637 = vmatprep.subr.bf16.mxu0 %v1942_v15 }
 0x8f5   :  { %1622 = vmatmul.mubr.msk.bf16.vlgmr.msra.gmra.mxu1 %vm264_vm2, %v926_v14 }
 0x8f6   :  { %1633 = vmatprep.mubr.msk.bf16.mxu1 %vm1943_vm1, %v1942_v15 }
 0x8f9   :  { %1628 = vmatmul.mubr.msk.bf16.vlgmr.msra.gmra.mxu0 %vm264_vm2, %v976_v16 }
 0x8fa   :  { %1639 = vmatprep.mubr.msk.bf16.mxu0 %vm1943_vm1, %v1942_v15 }
 0x9ad   :  { %v871_v17 = vpop.f32.mrf.mxu1 }
 0x9af   :  { %v1611_v18 = vpop.f32.mrf.mxu1 }
 0x9b1   :  { %v874_v19 = vpop.f32.mrf.mxu1  ;;  %v919_v20 = vpop.f32.mrf.mxu0 }
 0x9b2   :  { %v1699_v41 = vpack.i.bf16 %v919_v20, %v871_v17 }
 0x9b3   :  { %v1612_v21 = vpop.f32.mrf.mxu1  ;;  %v1617_v22 = vpop.f32.mrf.mxu0 }
 0x9b5   :  { %v922_v23 = vpop.f32.mrf.mxu0  ;;  %v969_v24 = vpop.f32.mrf.mxu1 }
 0x9b6   :  { %v1025_v25 = vsel %vm264_vm2, %v969_v24, -inf }
 0x9b7   :  { %1026 = vmax.xlane.f32.xlu0 %v1025_v25  ;;  %v1618_v26 = vpop.f32.mrf.mxu0  ;;  %v1623_v28 = vpop.f32.mrf.mxu1 }
 0x9b8   :  { %v1481_v26 = vld [vmem:[#allocation7 + $0x3] ss:$0 sm:$0xff] }
 0x9b9   :  { %v972_v29 = vpop.f32.mrf.mxu1  ;;  %v1019_v32 = vpop.f32.mrf.mxu0 }
 0x9ba   :  { %v1028_v33 = vsel %vm264_vm2, %v1019_v32, -inf }
 0x9bb   :  { %v1624_v34 = vpop.f32.mrf.mxu1  ;;  %1029 = vmax.xlane.f32.xlu1 %v1028_v33  ;;  %v1629_v35 = vpop.f32.mrf.mxu0 }
 0x9bd   :  { %v1022_v37 = vpop.f32.mrf.mxu0 }
 0x9bf   :  { %v1630_v38 = vpop.f32.mrf.mxu0 }
 0x9cc   :  { %1097 = vrot.lane.b32.xlu1 %v2084_v7, %s1954_s3 }
 0x9d0   :  { %1695 = vrot.lane.b32.xlu1 %v1694_v31, %s1938_s20 }
 0x9d4   :  { %1700 = vrot.lane.b32.xlu1 %v1699_v41, %s1955_s21 }
 0xa40   :  { %v1027_v42 = vpop.xlane.xlu0 %1026 }
 0xa41   :  { %v1031_v44 = vsub.f32 %v969_v24, %v1027_v42 }
 0xa43   :  { %v1033_v45 = vmul.f32 1.442695, %v1031_v44 }
 0xa44   :  { %v1030_v46 = vpop.xlane.xlu1 %1029 }
 0xa45   :  { %1745 = vpow2.f32 %v1033_v45  ;;  %v1032_v47 = vsub.f32 %v1019_v32, %v1030_v46 }
 0xa47   :  { %v1035_v48 = vmul.f32 1.442695, %v1032_v47 }
 0xa48   :  { %v1098_v49 = vpop.permute.xlu1 %1097 }
 0xa49   :  { %1747 = vpow2.f32 %v1035_v48  ;;  %v1103_v51 = vsel %vm390_vm3, %v1098_v49, 0 }
 0xa4a   :  { %1638 = vmatpush3.bf16.msra.mxu0 %v1103_v51  ;;  %v1713_v51 = vld [vmem:[#allocation11 + $0x8] sm:$0xff]  }
 0xa4b   :  { %1651 = vmatprep.subr.bf16.mxu0 %v1942_v15 }
 0xa4c   :  { %v1696_v10 = vpop.permute.xlu1 %1695 }
 0xa4d   :  { %v1698_v11 = vunpack.i.h.bf16 %v1696_v10  ;;  %v1697_v12 = vunpack.i.l.bf16 %v1696_v10 }
 0xa4f   :  { %v1170_v17 = vsel %vm264_vm2, %v2118_v40, %v1698_v11  ;;  %v1169_v18 = vsel %vm264_vm2, %v2116_v36, %v1697_v12 }
 0xa50   :  { %v1701_v50 = vpop.permute.xlu1 %1700 }
 0xa51   :  { %v1703_v13 = vunpack.i.h.bf16 %v1701_v50  ;;  %v1702_v14 = vunpack.i.l.bf16 %v1701_v50 }
 0xa52   :  { %v1746_v7 = vpop.eup %1745 }
 0xa53   :  { %v1037_v27 = vsel %vm264_vm2, %v1746_v7, 0.0  ;;  %v1172_v21 = vsel %vm1171_vm4, %v1169_v18, %v1702_v14  ;;  %v1173_v22 = vsel %vm1171_vm4, %v1170_v17, %v1703_v13 }
 0xa54   :  { %1038 = vadd.xlane.f32.xlu0 %v1037_v27 }
 0xa56   :  { %v1748_v30 = vpop.eup %1747 }
 0xa57   :  { %v1040_v31 = vsel %vm264_vm2, %v1748_v30, 0.0 }
 0xa58   :  { %1041 = vadd.xlane.f32.xlu0 %v1040_v31 }
 0xa6e   :  { %1049 = vrot.lane.b32.xlu0 %v2082_v6, %s1954_s3 }
 0xadd   :  { %v1039_v53 = vpop.xlane.xlu0 %1038 }
 0xade   :  { %1749 = vrcp.f32 %v1039_v53 }
 0xae1   :  { %v1042_v54 = vpop.xlane.xlu0 %1041 }
 0xae2   :  { %1751 = vrcp.f32 %v1042_v54 }
 0xae5   :  { %v1050_v55 = vpop.permute.xlu0 %1049 }
 0xae6   :  { %v1055_v56 = vsel %vm390_vm3, %v1050_v55, 0 }
 0xae7   :  { %1632 = vmatpush3.bf16.msra.mxu1 %v1055_v56 }
 0xae8   :  { %1643 = vmatprep.subr.bf16.mxu1 %v1942_v15 }
 0xaeb   :  { %v1750_v57 = vpop.eup %1749 }
 0xaec   :  { %v1045_v58 = vmul.f32 %v1750_v57, %v1746_v7  ;;  %v1714_v7 = vld [vmem:[#allocation11] sm:$0xff]  }
 0xaee   :  { %v1047_v59 = vpack.c.bf16 %v1045_v58, %v1045_v58  ;;  %v1485_v58 = vld [vmem:[#allocation5 + $0x2] ss:$0 sm:$0xff] }
 0xaef   :  { %v1752_v39 = vpop.eup %1751 }
 0xaf0   :  { %1634 = vmatmul.mubr.msk.bf16.vlgmr.msra.gmra.mxu1 %vm264_vm2, %v1047_v59  ;;  %v1046_v43 = vmul.f32 %v1752_v39, %v1748_v30 }
 0xaf1   :  { %1647 = vmatprep.mubr.msk.bf16.mxu1 %vm1943_vm1, %v1942_v15  ;;  %1644 = vmatpush3.bf16.msra.mxu1 %v1711_v60 }
 0xaf2   :  { %v1048_v6 = vpack.c.bf16 %v1046_v43, %v1046_v43  ;;  %1645 = vmatprep.subr.bf16.mxu1 %v1942_v15 }
 0xaf4   :  { %1640 = vmatmul.mubr.msk.bf16.vlgmr.msra.gmra.mxu0 %vm264_vm2, %v1048_v6  ;;  %v1486_v6 = vld [vmem:[#allocation5 + $0x3] ss:$0 sm:$0xff] }
 0xaf5   :  { %1655 = vmatprep.mubr.msk.bf16.mxu0 %vm1943_vm1, %v1942_v15  ;;  %1646 = vmatpush3.bf16.msra.mxu1 %v1712_v52 }
 0xaf6   :  { %1659 = vmatprep.subr.bf16.mxu1 %v1942_v15  ;;  %1652 = vmatpush3.bf16.msra.mxu0 %v1713_v51 }
 0xaf7   :  { %1653 = vmatprep.subr.bf16.mxu0 %v1942_v15 }
 0xafa   :  { %1654 = vmatpush3.bf16.msra.mxu0 %v1714_v7 }
 0xbb0   :  { %v1091_v61 = vpop.f32.mrf.mxu1 }
 0xbb2   :  { %v1635_v62 = vpop.f32.mrf.mxu1 }
 0xbb4   :  { %v1094_v63 = vpop.f32.mrf.mxu1  ;;  %v1139_v2 = vpop.f32.mrf.mxu0 }
 0xbb5   :  { %v1704_v3 = vpack.i.bf16 %v1139_v2, %v1091_v61  ;;  %v1715_v63 = vld [vmem:[#allocation13 + $0x8] sm:$0xff]   ;;  %v1716_v2 = vld [vmem:[#allocation13] sm:$0xff]  }
 0xbb6   :  { %v1636_v4 = vpop.f32.mrf.mxu1  ;;  %v1641_v5 = vpop.f32.mrf.mxu0 }
 0xbb7   :  { %1705 = vrot.lane.b32.xlu0 %v1704_v3, %s1956_s22  ;;  %v1487_v3 = vld [vmem:[#allocation7 + $0x4] ss:$0 sm:$0xff] }
 0xbb8   :  { %v1142_v8 = vpop.f32.mrf.mxu0 }
 0xbba   :  { %v1642_v9 = vpop.f32.mrf.mxu0 }
 0xc29   :  { %v1706_v16 = vpop.permute.xlu0 %1705 }
 0xc2a   :  { %v1708_v19 = vunpack.i.h.bf16 %v1706_v16  ;;  %v1707_v20 = vunpack.i.l.bf16 %v1706_v16 }
 0xc2c   :  { %v1176_v23 = vsel %vm1174_vm5, %v1173_v22, %v1708_v19  ;;  %v1175_v24 = vsel %vm1174_vm5, %v1172_v21, %v1707_v20 }
 0xc2d   :  { %v1177_v25 = vpack.c.bf16 %v1176_v23, %v1175_v24 }
 0xc2f   :  { %1648 = vmatmul.mubr.msk.bf16.vlgmr.msra.gmra.mxu1 %vm125_vm0, %v1177_v25 }
 0xc30   :  { %1663 = vmatprep.mubr.msk.bf16.mxu1 %vm1943_vm1, %v1942_v15  ;;  %1660 = vmatpush3.bf16.msra.mxu1 %v1715_v63 }
 0xc31   :  { %1661 = vmatprep.subr.bf16.mxu1 %v1942_v15 }
 0xc34   :  { %1662 = vmatpush3.bf16.msra.mxu1 %v1716_v2 }
 0xcef   :  { %v1236_v28 = vpop.f32.mrf.mxu1 }
 0xcf0   :  { %v1237_v29 = vadd.f32 %v1481_v26, %v1236_v28 }
 0xcf1   :  { %v1649_v32 = vpop.f32.mrf.mxu1 }
 0xcf2   :  { %v2216_v40 = vadd.f32 %v1237_v29, %v2034_v0 }
 0xcf3   :  { %v1239_v36 = vpop.f32.mrf.mxu1 }
 0xcf4   :  { %v1240_v33 = vadd.f32 %v1481_v26, %v1239_v36  ;;  %v1245_v34 = vsel %vm125_vm0, %v2216_v40, 0.0  ;;  %v1491_v36 = vld [vmem:[#allocation7 + $0x5] ss:$0 sm:$0xff] }
 0xcf5   :  { %1246 = vadd.xlane.f32.xlu1 %v1245_v34  ;;  %v1650_v35 = vpop.f32.mrf.mxu1 }
 0xcf6   :  { %v2221_v37 = vadd.f32 %v1240_v33, %v2036_v1 }
 0xcf8   :  { %v1248_v38 = vsel %vm125_vm0, %v2221_v37, 0.0 }
 0xcf9   :  { %1249 = vadd.xlane.f32.xlu0 %v1248_v38 }
 0xd7e   :  { %v1247_v41 = vpop.xlane.xlu1 %1246 }
 0xd7f   :  { %v1251_v42 = vmul.f32 0.03125, %v1247_v41 }
 0xd81   :  { %v1253_v44 = vsub.f32 %v2216_v40, %v1251_v42 }
 0xd82   :  { %v1250_v0 = vpop.xlane.xlu0 %1249 }
 0xd83   :  { %v1252_v45 = vmul.f32 0.03125, %v1250_v0  ;;  %v1255_v46 = vmul.f32 %v1253_v44, %v1253_v44 }
 0xd85   :  { %v1254_v47 = vsub.f32 %v2221_v37, %v1252_v45  ;;  %v1257_v48 = vsel %vm125_vm0, %v1255_v46, 0.0 }
 0xd86   :  { %1258 = vadd.xlane.f32.xlu0 %v1257_v48 }
 0xd87   :  { %v1256_v49 = vmul.f32 %v1254_v47, %v1254_v47 }
 0xd89   :  { %v1260_v1 = vsel %vm125_vm0, %v1256_v49, 0.0 }
 0xd8a   :  { %1261 = vadd.xlane.f32.xlu0 %v1260_v1 }
 0xe0f   :  { %v1259_v27 = vpop.xlane.xlu0 %1258 }
 0xe10   :  { %v1263_v30 = vmul.f32 0.03125, %v1259_v27 }
 0xe12   :  { %v1265_v31 = vadd.f32 1e-05, %v1263_v30 }
 0xe13   :  { %v1262_v53 = vpop.xlane.xlu0 %1261 }
 0xe14   :  { %1753 = vrsqrt.f32 %v1265_v31  ;;  %v1264_v54 = vmul.f32 0.03125, %v1262_v53 }
 0xe16   :  { %v1266_v55 = vadd.f32 1e-05, %v1264_v54 }
 0xe18   :  { %1755 = vrsqrt.f32 %v1266_v55 }
 0xe21   :  { %v1754_v56 = vpop.eup %1753 }
 0xe22   :  { %v1269_v57 = vmul.f32 %v1754_v56, %v1253_v44 }
 0xe24   :  { %v1275_v43 = vmul.f32 %v1485_v58, %v1269_v57 }
 0xe25   :  { %v1756_v59 = vpop.eup %1755 }
 0xe26   :  { %v1270_v39 = vmul.f32 %v1756_v59, %v1254_v47  ;;  %v1281_v52 = vadd.f32 %v1486_v6, %v1275_v43 }
 0xe28   :  { %v1276_v60 = vmul.f32 %v1485_v58, %v1270_v39 }
 0xe2a   :  { %v1282_v61 = vadd.f32 %v1486_v6, %v1276_v60 }
 0xe2c   :  { %v1283_v62 = vpack.c.bf16 %v1282_v61, %v1281_v52 }
 0xe2e   :  { %1656 = vmatmul.mubr.msk.bf16.vlgmr.msra.gmra.mxu0 %vm125_vm0, %v1283_v62 }
 0xeee   :  { %v1342_v4 = vpop.f32.mrf.mxu0 }
 0xeef   :  { %v1343_v5 = vadd.f32 %v1487_v3, %v1342_v4 }
 0xef0   :  { %v1657_v8 = vpop.f32.mrf.mxu0 }
 0xef1   :  { %v1349_v9 = vmul.f32 %v1343_v5, %v1343_v5 }
 0xef2   :  { %v1345_v10 = vpop.f32.mrf.mxu0 }
 0xef3   :  { %v1351_v50 = vmul.f32 %v1349_v9, %v1343_v5  ;;  %v1346_v11 = vadd.f32 %v1487_v3, %v1345_v10 }
 0xef4   :  { %v1658_v12 = vpop.f32.mrf.mxu0 }
 0xef5   :  { %v1353_v13 = vmul.f32 0.044715, %v1351_v50  ;;  %v1350_v14 = vmul.f32 %v1346_v11, %v1346_v11 }
 0xef7   :  { %v1355_v16 = vadd.f32 %v1353_v13, %v1343_v5  ;;  %v1352_v17 = vmul.f32 %v1350_v14, %v1346_v11 }
 0xef9   :  { %v1357_v18 = vmul.f32 0.7978846, %v1355_v16  ;;  %v1354_v19 = vmul.f32 0.044715, %v1352_v17 }
 0xefb   :  { %1757 = vtanh.f32 %v1357_v18  ;;  %v1356_v20 = vadd.f32 %v1354_v19, %v1346_v11 }
 0xefd   :  { %v1358_v15 = vmul.f32 0.7978846, %v1356_v20 }
 0xeff   :  { %1759 = vtanh.f32 %v1358_v15 }
 0xf08   :  { %v1758_v21 = vpop.eup %1757 }
 0xf09   :  { %v1361_v22 = vadd.f32 1.0, %v1758_v21 }
 0xf0b   :  { %v1363_v24 = vmul.f32 0.5, %v1361_v22 }
 0xf0c   :  { %v1760_v23 = vpop.eup %1759 }
 0xf0d   :  { %v1362_v25 = vadd.f32 1.0, %v1760_v23  ;;  %v1365_v28 = vmul.f32 %v1363_v24, %v1343_v5 }
 0xf0f   :  { %v1364_v26 = vmul.f32 0.5, %v1362_v25 }
 0xf11   :  { %v1366_v29 = vmul.f32 %v1364_v26, %v1346_v11 }
 0xf13   :  { %v1367_v32 = vpack.c.bf16 %v1366_v29, %v1365_v28 }
 0xf15   :  { %1664 = vmatmul.mubr.msk.bf16.vlgmr.msra.gmra.mxu1 %vm125_vm0, %v1367_v32 }
 0xfd5   :  { %v1426_v33 = vpop.f32.mrf.mxu1 }
 0xfd6   :  { %v1427_v34 = vadd.f32 %v1491_v36, %v1426_v33 }
 0xfd7   :  { %v1665_v35 = vpop.f32.mrf.mxu1 }
 0xfd8   :  { %v1433_v38 = vadd.f32 %v1427_v34, %v2216_v40 }
 0xfd9   :  { %v1429_v41 = vpop.f32.mrf.mxu1 }
 0xfda   :  { %1435 = vst.msk [vmem:[#allocation14] sm:$0xff] %vm125_vm0, %v1433_v38  ;;  %v1430_v42 = vadd.f32 %v1491_v36, %v1429_v41 }
 0xfdb   :  { %v1666_v44 = vpop.f32.mrf.mxu1 }
 0xfdc   :  { %v1434_v0 = vadd.f32 %v1430_v42, %v2221_v37 }
 0xfde   :  { %1436 = vst.msk [vmem:[#allocation14 + $0x8] sm:$0xff] %vm125_vm0, %v1434_v0 }
 0xfdf   :  { %1912 = shalt.err (!%p1909_p11)
}
 0xfe0   :  { %1448 = dma.vmem_to_hbm [thread:$0]  %s1443_s24, 256, %s2250_s7, [#allocation4], %s1937_s19, %s1937_s19, %s1938_s20  }
 0xfe1   :  { %1929 = dma.done.wait [#allocation4], 256  }
 0xfe2   :  { %1930 = vsyncadd [#allocation4], 4294967040 }
 0xfe3   :  { %1452 = vsyncpa [#allocation3], 1 }
 0xfe4   :  { %1453 = vsyncpa [#allocation6], 1 }
 0xfe5   :  { %1454 = vsyncpa [#allocation9], 1 }
 0xfe6   :  { %1455 = vsyncpa [#allocation12], 1 }
 0xfe7   :  { %1456 = vsyncpa [#allocation4], 1 }

// kernel: tpu_custom_call.1
= control target key start
LH: loop header
LB: loop body
LE: loop exit
PB: predicated region body
PF: predicated region fallthrough
CT: control target
= control target key end

     0   :  { %12 = vsyncpa [#allocation3], 0  ;;  %s2243_s0 = inlined_call_operand.hbm [shape: f32[2,8,32], index: 0, kind: input, shape index: {}]   ;;  %s2244_s1 = inlined_call_operand.hbm [shape: f32[4,32], index: 1, kind: input, shape index: {}]   ;;  %s2245_s2 = inlined_call_operand.hbm [shape: f32[6,32], index: 2, kind: input, shape index: {}]   ;;  %s2246_s3 = inlined_call_operand.hbm [shape: bf16[32,96], index: 3, kind: input, shape index: {}]   ;;  %s2247_s4 = inlined_call_operand.hbm [shape: bf16[32,32], index: 4, kind: input, shape index: {}]   ;;  %s2248_s5 = inlined_call_operand.hbm [shape: bf16[32,32], index: 5, kind: input, shape index: {}]   ;;  %s2249_s6 = inlined_call_operand.hbm [shape: bf16[32,32], index: 6, kind: input, shape index: {}]   ;;  %s2250_s7 = inlined_call_operand.hbm [shape: f32[2,8,32], index: 7, kind: output, shape index: {}]  }
   0x1   :  { %13 = vsyncpa [#allocation6], 0 }
   0x2   :  { %14 = vsyncpa [#allocation9], 0 }
   0x3   :  { %15 = vsyncpa [#allocation12], 0 }
   0x4   :  { %16 = vsyncpa [#allocation4], 0  ;;  %s1931_s24 = smov [#allocation5]   ;;  %s1932_s26 = smov [#allocation8]  }
   0x5   :  { %s35_s25 = sshll.u32 %s1931_s24, 4  ;;  %s54_s27 = sshll.u32 %s1932_s26, 4  ;;  %s36_s25 = int_to_ptr.vmem [resolvable:$true] %s35_s25  ;;  %s55_s27 = int_to_ptr.vmem [resolvable:$true] %s54_s27 }
   0x6   :  { %s1769_s28 = scalar_lea.vmem %s36_s25, 64  ;;  %p1774_p1 = scmp.lt.s32.totalorder %s36_s25, %s36_s25 }
   0x7   :  { %p1770_p0 = scmp.ne.s32.totalorder %s36_s25, %s1769_s28  ;;  %p1775_p2 = scmp.lt.s32.totalorder %s1769_s28, %s1769_s28 }
   0x9   :  { %p1776_p3 = por %p1775_p2, %p1774_p1 }
   0xb   :  { %p1777_p4 = pnand %p1776_p3, %p1770_p0 }
   0xd   :  { %1780 = shalt.err (!%p1777_p4)
}
   0xe   :  { %38 = dma.hbm_to_vmem [thread:$0]  %s2244_s1, 64, %s36_s25, [#allocation6]  }
   0xf   :  { %s1789_s8 = scalar_lea.vmem %s55_s27, 256  ;;  %p1794_p6 = scmp.lt.s32.totalorder %s55_s27, %s55_s27 }
  0x10   :  { %p1790_p5 = scmp.ne.s32.totalorder %s55_s27, %s1789_s8  ;;  %p1795_p7 = scmp.lt.s32.totalorder %s1789_s8, %s1789_s8 }
  0x12   :  { %p1796_p8 = por %p1795_p7, %p1794_p6 }
  0x14   :  { %p1797_p9 = pnand %p1796_p8, %p1790_p5 }
  0x16   :  { %1800 = shalt.err (!%p1797_p9)
}
  0x17   :  { %s1933_s9 = smov 64   ;;  %s1934_s10 = smov 4  }
  0x18   :  { %60 = dma.hbm_to_vmem [thread:$0]  %s2246_s3, 256, %s55_s27, [#allocation9], %s1933_s9, %s1933_s9, %s1934_s10  }
  0x19   :  { %s1935_s13 = smov [#allocation11]   ;;  %s1936_s15 = smov [#allocation2]  }
  0x1a   :  { %s78_s14 = sshll.u32 %s1935_s13, 4  ;;  %s22_s1 = sshll.u32 %s1936_s15, 4  ;;  %s79_s14 = int_to_ptr.vmem [resolvable:$true] %s78_s14  ;;  %s23_s1 = int_to_ptr.vmem [resolvable:$true] %s22_s1 }
  0x1b   :  { %s1809_s16 = scalar_lea.vmem %s79_s14, 256  ;;  %p1814_p11 = scmp.lt.s32.totalorder %s79_s14, %s79_s14 }
  0x1c   :  { %p1810_p10 = scmp.ne.s32.totalorder %s79_s14, %s1809_s16  ;;  %p1815_p12 = scmp.lt.s32.totalorder %s1809_s16, %s1809_s16 }
  0x1e   :  { %p1816_p13 = por %p1815_p12, %p1814_p11 }
  0x20   :  { %p1817_p0 = pnand %p1816_p13, %p1810_p10 }
  0x22   :  { %1820 = shalt.err (!%p1817_p0)
}
  0x23   :  { %84 = dma.hbm_to_vmem [thread:$0]  %s2248_s5, 256, %s79_s14, [#allocation12], %s1933_s9, %s1933_s9, %s1934_s10  }
  0x24   :  { %s1829_s3 = scalar_lea.vmem %s23_s1, 256  ;;  %p1834_p2 = scmp.lt.s32.totalorder %s23_s1, %s23_s1 }
  0x25   :  { %p1830_p1 = scmp.ne.s32.totalorder %s23_s1, %s1829_s3  ;;  %p1835_p3 = scmp.lt.s32.totalorder %s1829_s3, %s1829_s3 }
  0x27   :  { %p1836_p4 = por %p1835_p3, %p1834_p2 }
  0x29   :  { %p1837_p5 = pnand %p1836_p4, %p1830_p1 }
  0x2b   :  { %1840 = shalt.err (!%p1837_p5)
}
  0x2c   :  { %s1937_s19 = smov 128   ;;  %s1938_s20 = smov 8  }
  0x2d   :  { %28 = dma.hbm_to_vmem [thread:$0]  %s2243_s0, 256, %s23_s1, [#allocation3], %s1937_s19, %s1937_s19, %s1938_s20  }
  0x2e   :  { %s1939_s23 = smov [#allocation7]   ;;  %s1940_s25 = smov [#allocation10]  }
  0x2f   :  { %s45_s24 = sshll.u32 %s1939_s23, 4  ;;  %s66_s5 = sshll.u32 %s1940_s25, 4  ;;  %s46_s24 = int_to_ptr.vmem [resolvable:$true] %s45_s24  ;;  %s67_s5 = int_to_ptr.vmem [resolvable:$true] %s66_s5 }
  0x30   :  { %s1849_s26 = scalar_lea.vmem %s46_s24, 128  ;;  %p1854_p7 = scmp.lt.s32.totalorder %s46_s24, %s46_s24 }
  0x31   :  { %p1850_p6 = scmp.ne.s32.totalorder %s46_s24, %s1849_s26  ;;  %p1855_p8 = scmp.lt.s32.totalorder %s1849_s26, %s1849_s26 }
  0x33   :  { %p1856_p9 = por %p1855_p8, %p1854_p7 }
  0x35   :  { %p1857_p10 = pnand %p1856_p9, %p1850_p6 }
  0x37   :  { %1860 = shalt.err (!%p1857_p10)
}
  0x38   :  { %48 = dma.hbm_to_vmem [thread:$0]  %s2245_s2, 128, %s46_s24, [#allocation6]  }
  0x39   :  { %s1869_s29 = scalar_lea.vmem %s67_s5, 256  ;;  %p1874_p12 = scmp.lt.s32.totalorder %s67_s5, %s67_s5 }
  0x3a   :  { %p1870_p11 = scmp.ne.s32.totalorder %s67_s5, %s1869_s29  ;;  %p1875_p13 = scmp.lt.s32.totalorder %s1869_s29, %s1869_s29 }
  0x3c   :  { %p1876_p0 = por %p1875_p13, %p1874_p12 }
  0x3e   :  { %p1877_p1 = pnand %p1876_p0, %p1870_p11 }
  0x40   :  { %1880 = shalt.err (!%p1877_p1)
}
  0x41   :  { %72 = dma.hbm_to_vmem [thread:$0]  %s2247_s4, 256, %s67_s5, [#allocation9], %s1933_s9, %s1933_s9, %s1934_s10  }
  0x42   :  { %s1941_s8 = smov [#allocation13]  }
  0x43   :  { %s90_s11 = sshll.u32 %s1941_s8, 4  ;;  %s91_s11 = int_to_ptr.vmem [resolvable:$true] %s90_s11 }
  0x44   :  { %s1889_s12 = scalar_lea.vmem %s91_s11, 256  ;;  %p1894_p3 = scmp.lt.s32.totalorder %s91_s11, %s91_s11 }
  0x45   :  { %p1890_p2 = scmp.ne.s32.totalorder %s91_s11, %s1889_s12  ;;  %p1895_p4 = scmp.lt.s32.totalorder %s1889_s12, %s1889_s12 }
  0x47   :  { %p1896_p5 = por %p1895_p4, %p1894_p3 }
  0x49   :  { %p1897_p6 = pnand %p1896_p5, %p1890_p2 }
  0x4b   :  { %1900 = shalt.err (!%p1897_p6)
}
  0x4c   :  { %96 = dma.hbm_to_vmem [thread:$0]  %s2249_s6, 256, %s91_s11, [#allocation12], %s1933_s9, %s1933_s9, %s1934_s10  }
  0x4d   :  { %1921 = dma.done.wait [#allocation3], 256  }
  0x4e   :  { %1922 = vsyncadd [#allocation3], 4294967040 }
  0x4f   :  { %1923 = dma.done.wait [#allocation6], 192  }
  0x50   :  { %1924 = vsyncadd [#allocation6], 4294967104 }
  0x51   :  { %1925 = dma.done.wait [#allocation9], 512  }
  0x52   :  { %1926 = vsyncadd [#allocation9], 4294966784 }
  0x53   :  { %1927 = dma.done.wait [#allocation12], 512  }
  0x54   :  { %1928 = vsyncadd [#allocation12], 4294966784  ;;  %vm125_vm0 = vcmask 261120   ;;  %v2034_v0 = vld [vmem:[#allocation2] sm:$0xff]  ;;  %v2036_v1 = vld [vmem:[#allocation2 + $0x8] sm:$0xff]  ;;  %v1942_v15 = vmov 0.0  }
  0x55   :  { %v126_v2 = vsel %vm125_vm0, %v2034_v0, 0.0  ;;  %v129_v3 = vsel %vm125_vm0, %v2036_v1, 0.0  ;;  %v1709_v14 = vld [vmem:[#allocation8 + $0x8] sm:$0xff]   ;;  %1539 = vmatprep.subr.bf16.mxu0 %v1942_v15  ;;  %vm1943_vm1 = vmmov 0   ;;  %v1710_v16 = vld [vmem:[#allocation8] sm:$0xff]   ;;  %1547 = vmatprep.subr.bf16.mxu1 %v1942_v15  ;;  %s1944_s4 = smov 32  }
  0x56   :  { %127 = vadd.xlane.f32.xlu0 %v126_v2  ;;  %1543 = vmatprep.mubr.msk.bf16.mxu0 %vm1943_vm1, %v1942_v15  ;;  %v1463_v17 = vld [vmem:[#allocation7 + $0x1] ss:$0 sm:$0xff]  ;;  %v1457_v26 = vld [vmem:[#allocation5] ss:$0 sm:$0xff]  ;;  %v1458_v30 = vld [vmem:[#allocation5 + $0x1] ss:$0 sm:$0xff] }
  0x57   :  { %1540 = vmatpush3.bf16.msra.mxu0 %v1709_v14  ;;  %1549 = vmatprep.mubr.msk.bf16.mxu1 %vm1943_vm1, %v1942_v15  ;;  %s1945_s6 = smov 96   ;;  %vm264_vm2 = vcmask 64512   ;;  %v1462_v44 = vld [vmem:[#allocation7] ss:$0 sm:$0xff]  ;;  %v1464_v63 = vld [vmem:[#allocation7 + $0x2] ss:$0 sm:$0xff] }
  0x58   :  { %1541 = vmatprep.subr.bf16.mxu0 %v1942_v15  ;;  %s1946_s10 = smov 88   ;;  %s1947_s14 = smov 120   ;;  %vm390_vm3 = vcmask 1043456   ;;  %vm1171_vm4 = vcmask 130048   ;;  %vm1174_vm5 = vcmask 195584  }
  0x59   :  { %s1949_s15 = smov 80   ;;  %s1950_s1 = smov 112  }
  0x5a   :  { %130 = vadd.xlane.f32.xlu0 %v129_v3  ;;  %s1951_s16 = smov 48   ;;  %s1952_s17 = smov 72  }
  0x5b   :  { %1542 = vmatpush3.bf16.msra.mxu0 %v1710_v16  ;;  %s1953_s18 = smov 104   ;;  %s1954_s3 = smov 40  }
  0x5c   :  { %1553 = vmatprep.subr.bf16.mxu0 %v1942_v15  ;;  %s1955_s21 = smov 16   ;;  %s1956_s22 = smov 24  }
  0x5d   :  { %s1957_s23 = smov [#allocation14]  }
  0x5e   :  { %s1442_s24 = sshll.u32 %s1957_s23, 4  ;;  %s1443_s24 = int_to_ptr.vmem [resolvable:$true] %s1442_s24 }
  0x5f   :  { %s1901_s25 = scalar_lea.vmem %s1443_s24, 256  ;;  %p1906_p8 = scmp.lt.s32.totalorder %s1443_s24, %s1443_s24 }
  0x60   :  { %p1902_p7 = scmp.ne.s32.totalorder %s1443_s24, %s1901_s25  ;;  %p1907_p9 = scmp.lt.s32.totalorder %s1901_s25, %s1901_s25 }
  0x62   :  { %p1908_p10 = por %p1907_p9, %p1906_p8 }
  0x64   :  { %p1909_p11 = pnand %p1908_p10, %p1902_p7 }
  0x70   :  { %239 = vrot.lane.b32.xlu0 %v1463_v17, %s1944_s4 }
  0xdf   :  { %v128_v4 = vpop.xlane.xlu0 %127 }
  0xe0   :  { %v133_v5 = vmul.f32 0.03125, %v128_v4 }
  0xe2   :  { %v135_v6 = vsub.f32 %v2034_v0, %v133_v5 }
  0xe3   :  { %v131_v7 = vpop.xlane.xlu0 %130 }
  0xe4   :  { %v134_v8 = vmul.f32 0.03125, %v131_v7  ;;  %v137_v9 = vmul.f32 %v135_v6, %v135_v6 }
  0xe6   :  { %v136_v10 = vsub.f32 %v2036_v1, %v134_v8  ;;  %v139_v11 = vsel %vm125_vm0, %v137_v9, 0.0 }
  0xe7   :  { %140 = vadd.xlane.f32.xlu1 %v139_v11  ;;  %v240_v35 = vpop.permute.xlu0 %239 }
  0xe8   :  { %v138_v12 = vmul.f32 %v136_v10, %v136_v10 }
  0xea   :  { %v142_v13 = vsel %vm125_vm0, %v138_v12, 0.0 }
  0xeb   :  { %143 = vadd.xlane.f32.xlu1 %v142_v13 }
 0x170   :  { %v141_v18 = vpop.xlane.xlu1 %140 }
 0x171   :  { %v145_v19 = vmul.f32 0.03125, %v141_v18 }
 0x173   :  { %v147_v20 = vadd.f32 1e-05, %v145_v19 }
 0x174   :  { %v144_v21 = vpop.xlane.xlu1 %143 }
 0x175   :  { %1717 = vrsqrt.f32 %v147_v20  ;;  %v146_v22 = vmul.f32 0.03125, %v144_v21 }
 0x177   :  { %v148_v23 = vadd.f32 1e-05, %v146_v22 }
 0x179   :  { %1719 = vrsqrt.f32 %v148_v23 }
 0x182   :  { %v1718_v24 = vpop.eup %1717 }
 0x183   :  { %v151_v25 = vmul.f32 %v1718_v24, %v135_v6 }
 0x185   :  { %v157_v29 = vmul.f32 %v1457_v26, %v151_v25 }
 0x186   :  { %v1720_v27 = vpop.eup %1719 }
 0x187   :  { %v152_v28 = vmul.f32 %v1720_v27, %v136_v10  ;;  %v163_v32 = vadd.f32 %v1458_v30, %v157_v29 }
 0x189   :  { %v158_v31 = vmul.f32 %v1457_v26, %v152_v28 }
 0x18b   :  { %v164_v33 = vadd.f32 %v1458_v30, %v158_v31 }
 0x18d   :  { %v165_v34 = vpack.c.bf16 %v164_v33, %v163_v32 }
 0x18f   :  { %1544 = vmatmul.mubr.msk.bf16.vlgmr.msra.gmra.mxu0 %vm125_vm0, %v165_v34 }
 0x190   :  { %1555 = vmatprep.mubr.msk.bf16.mxu0 %vm1943_vm1, %v1942_v15 }
 0x24f   :  { %v219_v36 = vpop.f32.mrf.mxu0 }
 0x250   :  { %v242_v37 = vadd.f32 %v240_v35, %v219_v36  ;;  %v231_v47 = vadd.f32 %v1462_v44, %v219_v36 }
 0x251   :  { %v1545_v38 = vpop.f32.mrf.mxu0 }
 0x252   :  { %v2057_v39 = vpack.c.bf16 %v242_v37, %v242_v37  ;;  %v2066_v50 = vpack.c.bf16 %v231_v47, %v231_v47 }
 0x253   :  { %v222_v40 = vpop.f32.mrf.mxu0 }
 0x254   :  { %v243_v41 = vadd.f32 %v240_v35, %v222_v40  ;;  %262 = vrot.lane.b32.xlu1 %v2057_v39, %s1945_s6  ;;  %v232_v51 = vadd.f32 %v1462_v44, %v222_v40 }
 0x255   :  { %v1546_v42 = vpop.f32.mrf.mxu0 }
 0x256   :  { %v2060_v43 = vpack.c.bf16 %v243_v41, %v243_v41  ;;  %v2073_v52 = vpack.c.bf16 %v232_v51, %v232_v51 }
 0x258   :  { %312 = vrot.lane.b32.xlu1 %v2060_v43, %s1945_s6 }
 0x2c6   :  { %v263_v45 = vpop.permute.xlu1 %262 }
 0x2c7   :  { %v269_v46 = vsel %vm264_vm2, %v263_v45, 0 }
 0x2c8   :  { %1548 = vmatpush3.bf16.xpose.msra.mxu1 %v269_v46 }
 0x2c9   :  { %1559 = vmatprep.subr.bf16.mxu1 %v1942_v15 }
 0x2ca   :  { %v313_v48 = vpop.permute.xlu1 %312 }
 0x2cb   :  { %v318_v49 = vsel %vm264_vm2, %v313_v48, 0 }
 0x2cc   :  { %1554 = vmatpush3.bf16.xpose.msra.mxu0 %v318_v49 }
 0x2cd   :  { %1565 = vmatprep.subr.bf16.mxu0 %v1942_v15 }
 0x2cf   :  { %1550 = vmatmul.mubr.msk.bf16.vlgmr.msra.gmra.mxu1 %vm264_vm2, %v2066_v50 }
 0x2d0   :  { %1561 = vmatprep.mubr.msk.bf16.mxu1 %vm1943_vm1, %v1942_v15 }
 0x2d3   :  { %1556 = vmatmul.mubr.msk.bf16.vlgmr.msra.gmra.mxu0 %vm264_vm2, %v2073_v52 }
 0x2d4   :  { %1567 = vmatprep.mubr.msk.bf16.mxu0 %vm1943_vm1, %v1942_v15 }
 0x38f   :  { %v305_v53 = vpop.f32.mrf.mxu1 }
 0x390   :  { %v360_v54 = vsel %vm264_vm2, %v305_v53, -inf }
 0x391   :  { %361 = vmax.xlane.f32.xlu1 %v360_v54  ;;  %v1551_v55 = vpop.f32.mrf.mxu1 }
 0x393   :  { %v308_v56 = vpop.f32.mrf.mxu1  ;;  %v354_v57 = vpop.f32.mrf.mxu0 }
 0x394   :  { %v363_v58 = vsel %vm264_vm2, %v354_v57, -inf }
 0x395   :  { %v1552_v59 = vpop.f32.mrf.mxu1  ;;  %364 = vmax.xlane.f32.xlu0 %v363_v58  ;;  %v1557_v60 = vpop.f32.mrf.mxu0 }
 0x397   :  { %v357_v61 = vpop.f32.mrf.mxu0 }
 0x399   :  { %v1558_v62 = vpop.f32.mrf.mxu0 }
 0x3ab   :  { %250 = vrot.lane.b32.xlu0 %v1464_v63, %s1933_s9 }
 0x41a   :  { %v362_v8 = vpop.xlane.xlu1 %361 }
 0x41b   :  { %v366_v9 = vsub.f32 %v305_v53, %v362_v8 }
 0x41d   :  { %v368_v10 = vmul.f32 1.442695, %v366_v9 }
 0x41e   :  { %v365_v2 = vpop.xlane.xlu0 %364 }
 0x41f   :  { %v367_v11 = vsub.f32 %v354_v57, %v365_v2  ;;  %1721 = vpow2.f32 %v368_v10 }
 0x421   :  { %v370_v12 = vmul.f32 1.442695, %v367_v11 }
 0x422   :  { %v251_v3 = vpop.permute.xlu0 %250 }
 0x423   :  { %v253_v4 = vadd.f32 %v251_v3, %v219_v36  ;;  %v254_v5 = vadd.f32 %v251_v3, %v222_v40  ;;  %1723 = vpow2.f32 %v370_v12 }
 0x425   :  { %v2082_v6 = vpack.c.bf16 %v253_v4, %v253_v4  ;;  %v2084_v7 = vpack.c.bf16 %v254_v5, %v254_v5 }
 0x427   :  { %435 = vrot.lane.b32.xlu0 %v2084_v7, %s1933_s9  ;;  %385 = vrot.lane.b32.xlu1 %v2082_v6, %s1933_s9  ;;  %s1948_s9 = smov 56  }
 0x42b   :  { %486 = vrot.lane.b32.xlu0 %v2057_v39, %s1946_s10 }
 0x42c   :  { %v1722_v13 = vpop.eup %1721 }
 0x42d   :  { %v372_v14 = vsel %vm264_vm2, %v1722_v13, 0.0 }
 0x42f   :  { %484 = vrot.lane.b32.xlu0 %v2066_v50, %s1947_s14 }
 0x430   :  { %v1724_v16 = vpop.eup %1723 }
 0x431   :  { %v375_v17 = vsel %vm264_vm2, %v1724_v16, 0.0 }
 0x44b   :  { %373 = vadd.xlane.f32.xlu1 %v372_v14 }
 0x44f   :  { %376 = vadd.xlane.f32.xlu1 %v375_v17 }
 0x460   :  { %537 = vrot.lane.b32.xlu1 %v2060_v43, %s1946_s10 }
 0x464   :  { %535 = vrot.lane.b32.xlu1 %v2073_v52, %s1947_s14 }
 0x499   :  { %v436_v18 = vpop.permute.xlu0 %435  ;;  %v386_v19 = vpop.permute.xlu1 %385 }
 0x49a   :  { %v441_v20 = vsel %vm390_vm3, %v436_v18, 0  ;;  %v392_v21 = vsel %vm390_vm3, %v386_v19, 0 }
 0x49b   :  { %1560 = vmatpush3.bf16.msra.mxu1 %v392_v21  ;;  %1566 = vmatpush3.bf16.msra.mxu0 %v441_v20 }
 0x49c   :  { %1571 = vmatprep.subr.bf16.mxu1 %v1942_v15  ;;  %1577 = vmatprep.subr.bf16.mxu0 %v1942_v15 }
 0x49d   :  { %v487_v26 = vpop.permute.xlu0 %486 }
 0x49e   :  { %v492_v29 = vsel %vm264_vm2, %v487_v26, 0 }
 0x4a1   :  { %v485_v34 = vpop.permute.xlu0 %484 }
 0x4d4   :  { %v374_v22 = vpop.xlane.xlu1 %373 }
 0x4d5   :  { %1725 = vrcp.f32 %v374_v22 }
 0x4d8   :  { %v377_v23 = vpop.xlane.xlu1 %376 }
 0x4d9   :  { %1727 = vrcp.f32 %v377_v23 }
 0x4dc   :  { %v538_v31 = vpop.permute.xlu1 %537 }
 0x4dd   :  { %v543_v33 = vsel %vm264_vm2, %v538_v31, 0 }
 0x4e0   :  { %v536_v35 = vpop.permute.xlu1 %535 }
 0x4e2   :  { %v1726_v24 = vpop.eup %1725 }
 0x4e3   :  { %v380_v25 = vmul.f32 %v1726_v24, %v1722_v13 }
 0x4e5   :  { %v382_v27 = vpack.c.bf16 %v380_v25, %v380_v25 }
 0x4e6   :  { %v1728_v28 = vpop.eup %1727 }
 0x4e7   :  { %1562 = vmatmul.mubr.msk.bf16.vlgmr.msra.gmra.mxu1 %vm264_vm2, %v382_v27  ;;  %v381_v30 = vmul.f32 %v1728_v28, %v1724_v16 }
 0x4e8   :  { %1572 = vmatpush3.bf16.xpose.msra.mxu1 %v492_v29  ;;  %1573 = vmatprep.mubr.msk.bf16.mxu1 %vm1943_vm1, %v1942_v15 }
 0x4e9   :  { %v383_v32 = vpack.c.bf16 %v381_v30, %v381_v30  ;;  %1583 = vmatprep.subr.bf16.mxu1 %v1942_v15 }
 0x4eb   :  { %1568 = vmatmul.mubr.msk.bf16.vlgmr.msra.gmra.mxu0 %vm264_vm2, %v383_v32 }
 0x4ec   :  { %1578 = vmatpush3.bf16.xpose.msra.mxu0 %v543_v33  ;;  %1579 = vmatprep.mubr.msk.bf16.mxu0 %vm1943_vm1, %v1942_v15 }
 0x4ed   :  { %1589 = vmatprep.subr.bf16.mxu0 %v1942_v15 }
 0x4ef   :  { %1574 = vmatmul.mubr.msk.bf16.vlgmr.msra.gmra.mxu1 %vm264_vm2, %v485_v34 }
 0x4f0   :  { %1585 = vmatprep.mubr.msk.bf16.mxu1 %vm1943_vm1, %v1942_v15 }
 0x4f3   :  { %1580 = vmatmul.mubr.msk.bf16.vlgmr.msra.gmra.mxu0 %vm264_vm2, %v536_v35 }
 0x4f4   :  { %1591 = vmatprep.mubr.msk.bf16.mxu0 %vm1943_vm1, %v1942_v15 }
 0x5a7   :  { %v2116_v36 = vpop.f32.mrf.mxu1 }
 0x5a9   :  { %v1563_v37 = vpop.f32.mrf.mxu1 }
 0x5ab   :  { %v431_v38 = vpop.f32.mrf.mxu1  ;;  %v2118_v40 = vpop.f32.mrf.mxu0 }
 0x5ad   :  { %v1564_v41 = vpop.f32.mrf.mxu1  ;;  %v1569_v42 = vpop.f32.mrf.mxu0 }
 0x5af   :  { %v480_v44 = vpop.f32.mrf.mxu0  ;;  %v528_v45 = vpop.f32.mrf.mxu1 }
 0x5b0   :  { %v585_v46 = vsel %vm264_vm2, %v528_v45, -inf }
 0x5b1   :  { %586 = vmax.xlane.f32.xlu0 %v585_v46  ;;  %v1570_v47 = vpop.f32.mrf.mxu0  ;;  %v1575_v48 = vpop.f32.mrf.mxu1 }
 0x5b3   :  { %v531_v49 = vpop.f32.mrf.mxu1  ;;  %v579_v51 = vpop.f32.mrf.mxu0 }
 0x5b4   :  { %v588_v53 = vsel %vm264_vm2, %v579_v51, -inf }
 0x5b5   :  { %v1576_v54 = vpop.f32.mrf.mxu1  ;;  %589 = vmax.xlane.f32.xlu1 %v588_v53  ;;  %v1581_v55 = vpop.f32.mrf.mxu0 }
 0x5b7   :  { %v582_v56 = vpop.f32.mrf.mxu0 }
 0x5b9   :  { %v1582_v57 = vpop.f32.mrf.mxu0 }
 0x5c6   :  { %657 = vrot.lane.b32.xlu1 %v2084_v7, %s1948_s9 }
 0x5ca   :  { %707 = vrot.lane.b32.xlu1 %v2057_v39, %s1949_s15 }
 0x5ce   :  { %757 = vrot.lane.b32.xlu1 %v2060_v43, %s1949_s15 }
 0x5d2   :  { %755 = vrot.lane.b32.xlu1 %v2073_v52, %s1950_s1 }
 0x63a   :  { %v587_v58 = vpop.xlane.xlu0 %586 }
 0x63b   :  { %v591_v59 = vsub.f32 %v528_v45, %v587_v58 }
 0x63d   :  { %v593_v60 = vmul.f32 1.442695, %v591_v59 }
 0x63e   :  { %v590_v61 = vpop.xlane.xlu1 %589 }
 0x63f   :  { %1729 = vpow2.f32 %v593_v60  ;;  %v592_v62 = vsub.f32 %v579_v51, %v590_v61 }
 0x641   :  { %v595_v63 = vmul.f32 1.442695, %v592_v62 }
 0x642   :  { %v658_v2 = vpop.permute.xlu1 %657 }
 0x643   :  { %1731 = vpow2.f32 %v595_v63  ;;  %v663_v3 = vsel %vm390_vm3, %v658_v2, 0 }
 0x644   :  { %1590 = vmatpush3.bf16.msra.mxu0 %v663_v3 }
 0x645   :  { %1601 = vmatprep.subr.bf16.mxu0 %v1942_v15 }
 0x646   :  { %v708_v16 = vpop.permute.xlu1 %707 }
 0x647   :  { %v713_v20 = vsel %vm264_vm2, %v708_v16, 0 }
 0x64a   :  { %v758_v22 = vpop.permute.xlu1 %757 }
 0x64b   :  { %v763_v24 = vsel %vm264_vm2, %v758_v22, 0 }
 0x64c   :  { %v1730_v4 = vpop.eup %1729 }
 0x64d   :  { %v597_v5 = vsel %vm264_vm2, %v1730_v4, 0.0 }
 0x64e   :  { %598 = vadd.xlane.f32.xlu0 %v597_v5  ;;  %v756_v26 = vpop.permute.xlu1 %755 }
 0x650   :  { %v1732_v8 = vpop.eup %1731 }
 0x651   :  { %v600_v9 = vsel %vm264_vm2, %v1732_v8, 0.0 }
 0x652   :  { %601 = vadd.xlane.f32.xlu0 %v600_v9 }
 0x668   :  { %609 = vrot.lane.b32.xlu0 %v2082_v6, %s1948_s9 }
 0x66c   :  { %705 = vrot.lane.b32.xlu0 %v2066_v50, %s1950_s1 }
 0x6d7   :  { %v599_v10 = vpop.xlane.xlu0 %598 }
 0x6d8   :  { %1733 = vrcp.f32 %v599_v10 }
 0x6db   :  { %v602_v11 = vpop.xlane.xlu0 %601 }
 0x6dc   :  { %1735 = vrcp.f32 %v602_v11 }
 0x6df   :  { %v610_v12 = vpop.permute.xlu0 %609 }
 0x6e0   :  { %v615_v13 = vsel %vm390_vm3, %v610_v12, 0 }
 0x6e1   :  { %1584 = vmatpush3.bf16.msra.mxu1 %v615_v13 }
 0x6e2   :  { %1595 = vmatprep.subr.bf16.mxu1 %v1942_v15 }
 0x6e3   :  { %v706_v25 = vpop.permute.xlu0 %705 }
 0x6e5   :  { %v1734_v14 = vpop.eup %1733 }
 0x6e6   :  { %v605_v17 = vmul.f32 %v1734_v14, %v1730_v4 }
 0x6e8   :  { %v607_v18 = vpack.c.bf16 %v605_v17, %v605_v17 }
 0x6e9   :  { %v1736_v19 = vpop.eup %1735 }
 0x6ea   :  { %1586 = vmatmul.mubr.msk.bf16.vlgmr.msra.gmra.mxu1 %vm264_vm2, %v607_v18  ;;  %v606_v21 = vmul.f32 %v1736_v19, %v1732_v8 }
 0x6eb   :  { %1596 = vmatpush3.bf16.xpose.msra.mxu1 %v713_v20  ;;  %1597 = vmatprep.mubr.msk.bf16.mxu1 %vm1943_vm1, %v1942_v15 }
 0x6ec   :  { %v608_v23 = vpack.c.bf16 %v606_v21, %v606_v21  ;;  %1607 = vmatprep.subr.bf16.mxu1 %v1942_v15 }
 0x6ee   :  { %1592 = vmatmul.mubr.msk.bf16.vlgmr.msra.gmra.mxu0 %vm264_vm2, %v608_v23 }
 0x6ef   :  { %1602 = vmatpush3.bf16.xpose.msra.mxu0 %v763_v24  ;;  %1603 = vmatprep.mubr.msk.bf16.mxu0 %vm1943_vm1, %v1942_v15 }
 0x6f0   :  { %1613 = vmatprep.subr.bf16.mxu0 %v1942_v15 }
 0x6f2   :  { %1598 = vmatmul.mubr.msk.bf16.vlgmr.msra.gmra.mxu1 %vm264_vm2, %v706_v25 }
 0x6f3   :  { %1609 = vmatprep.mubr.msk.bf16.mxu1 %vm1943_vm1, %v1942_v15 }
 0x6f6   :  { %1604 = vmatmul.mubr.msk.bf16.vlgmr.msra.gmra.mxu0 %vm264_vm2, %v756_v26 }
 0x6f7   :  { %1615 = vmatprep.mubr.msk.bf16.mxu0 %vm1943_vm1, %v1942_v15 }
 0x7aa   :  { %v2150_v27 = vpop.f32.mrf.mxu1 }
 0x7ac   :  { %v1587_v28 = vpop.f32.mrf.mxu1 }
 0x7ae   :  { %v654_v29 = vpop.f32.mrf.mxu1  ;;  %v2152_v30 = vpop.f32.mrf.mxu0 }
 0x7af   :  { %v1694_v31 = vpack.i.bf16 %v2152_v30, %v2150_v27 }
 0x7b0   :  { %v1588_v32 = vpop.f32.mrf.mxu1  ;;  %v1593_v33 = vpop.f32.mrf.mxu0 }
 0x7b2   :  { %v702_v34 = vpop.f32.mrf.mxu0  ;;  %v749_v35 = vpop.f32.mrf.mxu1 }
 0x7b3   :  { %v805_v37 = vsel %vm264_vm2, %v749_v35, -inf }
 0x7b4   :  { %806 = vmax.xlane.f32.xlu0 %v805_v37  ;;  %v1594_v38 = vpop.f32.mrf.mxu0  ;;  %v1599_v41 = vpop.f32.mrf.mxu1 }
 0x7b6   :  { %v752_v42 = vpop.f32.mrf.mxu1  ;;  %v799_v44 = vpop.f32.mrf.mxu0 }
 0x7b7   :  { %v808_v45 = vsel %vm264_vm2, %v799_v44, -inf }
 0x7b8   :  { %v1600_v46 = vpop.f32.mrf.mxu1  ;;  %809 = vmax.xlane.f32.xlu1 %v808_v45  ;;  %v1605_v47 = vpop.f32.mrf.mxu0 }
 0x7ba   :  { %v802_v48 = vpop.f32.mrf.mxu0 }
 0x7bc   :  { %v1606_v49 = vpop.f32.mrf.mxu0 }
 0x7c9   :  { %877 = vrot.lane.b32.xlu1 %v2084_v7, %s1951_s16 }
 0x7cd   :  { %927 = vrot.lane.b32.xlu1 %v2057_v39, %s1952_s17 }
 0x7d1   :  { %977 = vrot.lane.b32.xlu1 %v2060_v43, %s1952_s17 }
 0x7d5   :  { %975 = vrot.lane.b32.xlu1 %v2073_v52, %s1953_s18 }
 0x83d   :  { %v807_v51 = vpop.xlane.xlu0 %806 }
 0x83e   :  { %v811_v53 = vsub.f32 %v749_v35, %v807_v51 }
 0x840   :  { %v813_v54 = vmul.f32 1.442695, %v811_v53 }
 0x841   :  { %v810_v55 = vpop.xlane.xlu1 %809 }
 0x842   :  { %1737 = vpow2.f32 %v813_v54  ;;  %v812_v56 = vsub.f32 %v799_v44, %v810_v55 }
 0x844   :  { %v815_v57 = vmul.f32 1.442695, %v812_v56 }
 0x845   :  { %v878_v58 = vpop.permute.xlu1 %877 }
 0x846   :  { %1739 = vpow2.f32 %v815_v57  ;;  %v883_v59 = vsel %vm390_vm3, %v878_v58, 0 }
 0x847   :  { %1614 = vmatpush3.bf16.msra.mxu0 %v883_v59 }
 0x848   :  { %1625 = vmatprep.subr.bf16.mxu0 %v1942_v15 }
 0x849   :  { %v928_v4 = vpop.permute.xlu1 %927 }
 0x84a   :  { %v933_v10 = vsel %vm264_vm2, %v928_v4, 0 }
 0x84d   :  { %v978_v11 = vpop.permute.xlu1 %977 }
 0x84e   :  { %v983_v13 = vsel %vm264_vm2, %v978_v11, 0 }
 0x84f   :  { %v1738_v39 = vpop.eup %1737 }
 0x850   :  { %v817_v43 = vsel %vm264_vm2, %v1738_v39, 0.0 }
 0x851   :  { %818 = vadd.xlane.f32.xlu0 %v817_v43  ;;  %v976_v16 = vpop.permute.xlu1 %975 }
 0x853   :  { %v1740_v60 = vpop.eup %1739 }
 0x854   :  { %v820_v52 = vsel %vm264_vm2, %v1740_v60, 0.0 }
 0x855   :  { %821 = vadd.xlane.f32.xlu0 %v820_v52  ;;  %v1712_v52 = vld [vmem:[#allocation10] sm:$0xff]  }
 0x86b   :  { %829 = vrot.lane.b32.xlu0 %v2082_v6, %s1951_s16 }
 0x86f   :  { %925 = vrot.lane.b32.xlu0 %v2066_v50, %s1953_s18 }
 0x8da   :  { %v819_v61 = vpop.xlane.xlu0 %818 }
 0x8db   :  { %1741 = vrcp.f32 %v819_v61 }
 0x8de   :  { %v822_v62 = vpop.xlane.xlu0 %821 }
 0x8df   :  { %1743 = vrcp.f32 %v822_v62 }
 0x8e2   :  { %v830_v63 = vpop.permute.xlu0 %829 }
 0x8e3   :  { %v835_v2 = vsel %vm390_vm3, %v830_v63, 0 }
 0x8e4   :  { %1608 = vmatpush3.bf16.msra.mxu1 %v835_v2 }
 0x8e5   :  { %1619 = vmatprep.subr.bf16.mxu1 %v1942_v15 }
 0x8e6   :  { %v926_v14 = vpop.permute.xlu0 %925 }
 0x8e8   :  { %v1742_v3 = vpop.eup %1741 }
 0x8e9   :  { %v825_v5 = vmul.f32 %v1742_v3, %v1738_v39 }
 0x8eb   :  { %v827_v8 = vpack.c.bf16 %v825_v5, %v825_v5 }
 0x8ec   :  { %v1744_v9 = vpop.eup %1743 }
 0x8ed   :  { %1610 = vmatmul.mubr.msk.bf16.vlgmr.msra.gmra.mxu1 %vm264_vm2, %v827_v8  ;;  %v826_v50 = vmul.f32 %v1744_v9, %v1740_v60  ;;  %v1711_v60 = vld [vmem:[#allocation10 + $0x8] sm:$0xff]  }
 0x8ee   :  { %1620 = vmatpush3.bf16.xpose.msra.mxu1 %v933_v10  ;;  %1621 = vmatprep.mubr.msk.bf16.mxu1 %vm1943_vm1, %v1942_v15 }
 0x8ef   :  { %v828_v12 = vpack.c.bf16 %v826_v50, %v826_v50  ;;  %1631 = vmatprep.subr.bf16.mxu1 %v1942_v15 }
 0x8f1   :  { %1616 = vmatmul.mubr.msk.bf16.vlgmr.msra.gmra.mxu0 %vm264_vm2, %v828_v12 }
 0x8f2   :  { %1626 = vmatpush3.bf16.xpose.msra.mxu0 %v983_v13  ;;  %1627 = vmatprep.mubr.msk.bf16.mxu0 %vm1943_vm1, %v1942_v15 }
 0x8f3   :  { %1637 = vmatprep.subr.bf16.mxu0 %v1942_v15 }
 0x8f5   :  { %1622 = vmatmul.mubr.msk.bf16.vlgmr.msra.gmra.mxu1 %vm264_vm2, %v926_v14 }
 0x8f6   :  { %1633 = vmatprep.mubr.msk.bf16.mxu1 %vm1943_vm1, %v1942_v15 }
 0x8f9   :  { %1628 = vmatmul.mubr.msk.bf16.vlgmr.msra.gmra.mxu0 %vm264_vm2, %v976_v16 }
 0x8fa   :  { %1639 = vmatprep.mubr.msk.bf16.mxu0 %vm1943_vm1, %v1942_v15 }
 0x9ad   :  { %v871_v17 = vpop.f32.mrf.mxu1 }
 0x9af   :  { %v1611_v18 = vpop.f32.mrf.mxu1 }
 0x9b1   :  { %v874_v19 = vpop.f32.mrf.mxu1  ;;  %v919_v20 = vpop.f32.mrf.mxu0 }
 0x9b2   :  { %v1699_v41 = vpack.i.bf16 %v919_v20, %v871_v17 }
 0x9b3   :  { %v1612_v21 = vpop.f32.mrf.mxu1  ;;  %v1617_v22 = vpop.f32.mrf.mxu0 }
 0x9b5   :  { %v922_v23 = vpop.f32.mrf.mxu0  ;;  %v969_v24 = vpop.f32.mrf.mxu1 }
 0x9b6   :  { %v1025_v25 = vsel %vm264_vm2, %v969_v24, -inf }
 0x9b7   :  { %1026 = vmax.xlane.f32.xlu0 %v1025_v25  ;;  %v1618_v26 = vpop.f32.mrf.mxu0  ;;  %v1623_v28 = vpop.f32.mrf.mxu1 }
 0x9b8   :  { %v1481_v26 = vld [vmem:[#allocation7 + $0x3] ss:$0 sm:$0xff] }
 0x9b9   :  { %v972_v29 = vpop.f32.mrf.mxu1  ;;  %v1019_v32 = vpop.f32.mrf.mxu0 }
 0x9ba   :  { %v1028_v33 = vsel %vm264_vm2, %v1019_v32, -inf }
 0x9bb   :  { %v1624_v34 = vpop.f32.mrf.mxu1  ;;  %1029 = vmax.xlane.f32.xlu1 %v1028_v33  ;;  %v1629_v35 = vpop.f32.mrf.mxu0 }
 0x9bd   :  { %v1022_v37 = vpop.f32.mrf.mxu0 }
 0x9bf   :  { %v1630_v38 = vpop.f32.mrf.mxu0 }
 0x9cc   :  { %1097 = vrot.lane.b32.xlu1 %v2084_v7, %s1954_s3 }
 0x9d0   :  { %1695 = vrot.lane.b32.xlu1 %v1694_v31, %s1938_s20 }
 0x9d4   :  { %1700 = vrot.lane.b32.xlu1 %v1699_v41, %s1955_s21 }
 0xa40   :  { %v1027_v42 = vpop.xlane.xlu0 %1026 }
 0xa41   :  { %v1031_v44 = vsub.f32 %v969_v24, %v1027_v42 }
 0xa43   :  { %v1033_v45 = vmul.f32 1.442695, %v1031_v44 }
 0xa44   :  { %v1030_v46 = vpop.xlane.xlu1 %1029 }
 0xa45   :  { %1745 = vpow2.f32 %v1033_v45  ;;  %v1032_v47 = vsub.f32 %v1019_v32, %v1030_v46 }
 0xa47   :  { %v1035_v48 = vmul.f32 1.442695, %v1032_v47 }
 0xa48   :  { %v1098_v49 = vpop.permute.xlu1 %1097 }
 0xa49   :  { %1747 = vpow2.f32 %v1035_v48  ;;  %v1103_v51 = vsel %vm390_vm3, %v1098_v49, 0 }
 0xa4a   :  { %1638 = vmatpush3.bf16.msra.mxu0 %v1103_v51  ;;  %v1713_v51 = vld [vmem:[#allocation11 + $0x8] sm:$0xff]  }
 0xa4b   :  { %1651 = vmatprep.subr.bf16.mxu0 %v1942_v15 }
 0xa4c   :  { %v1696_v10 = vpop.permute.xlu1 %1695 }
 0xa4d   :  { %v1698_v11 = vunpack.i.h.bf16 %v1696_v10  ;;  %v1697_v12 = vunpack.i.l.bf16 %v1696_v10 }
 0xa4f   :  { %v1170_v17 = vsel %vm264_vm2, %v2118_v40, %v1698_v11  ;;  %v1169_v18 = vsel %vm264_vm2, %v2116_v36, %v1697_v12 }
 0xa50   :  { %v1701_v50 = vpop.permute.xlu1 %1700 }
 0xa51   :  { %v1703_v13 = vunpack.i.h.bf16 %v1701_v50  ;;  %v1702_v14 = vunpack.i.l.bf16 %v1701_v50 }
 0xa52   :  { %v1746_v7 = vpop.eup %1745 }
 0xa53   :  { %v1037_v27 = vsel %vm264_vm2, %v1746_v7, 0.0  ;;  %v1172_v21 = vsel %vm1171_vm4, %v1169_v18, %v1702_v14  ;;  %v1173_v22 = vsel %vm1171_vm4, %v1170_v17, %v1703_v13 }
 0xa54   :  { %1038 = vadd.xlane.f32.xlu0 %v1037_v27 }
 0xa56   :  { %v1748_v30 = vpop.eup %1747 }
 0xa57   :  { %v1040_v31 = vsel %vm264_vm2, %v1748_v30, 0.0 }
 0xa58   :  { %1041 = vadd.xlane.f32.xlu0 %v1040_v31 }
 0xa6e   :  { %1049 = vrot.lane.b32.xlu0 %v2082_v6, %s1954_s3 }
 0xadd   :  { %v1039_v53 = vpop.xlane.xlu0 %1038 }
 0xade   :  { %1749 = vrcp.f32 %v1039_v53 }
 0xae1   :  { %v1042_v54 = vpop.xlane.xlu0 %1041 }
 0xae2   :  { %1751 = vrcp.f32 %v1042_v54 }
 0xae5   :  { %v1050_v55 = vpop.permute.xlu0 %1049 }
 0xae6   :  { %v1055_v56 = vsel %vm390_vm3, %v1050_v55, 0 }
 0xae7   :  { %1632 = vmatpush3.bf16.msra.mxu1 %v1055_v56 }
 0xae8   :  { %1643 = vmatprep.subr.bf16.mxu1 %v1942_v15 }
 0xaeb   :  { %v1750_v57 = vpop.eup %1749 }
 0xaec   :  { %v1045_v58 = vmul.f32 %v1750_v57, %v1746_v7  ;;  %v1714_v7 = vld [vmem:[#allocation11] sm:$0xff]  }
 0xaee   :  { %v1047_v59 = vpack.c.bf16 %v1045_v58, %v1045_v58  ;;  %v1485_v58 = vld [vmem:[#allocation5 + $0x2] ss:$0 sm:$0xff] }
 0xaef   :  { %v1752_v39 = vpop.eup %1751 }
 0xaf0   :  { %1634 = vmatmul.mubr.msk.bf16.vlgmr.msra.gmra.mxu1 %vm264_vm2, %v1047_v59  ;;  %v1046_v43 = vmul.f32 %v1752_v39, %v1748_v30 }
 0xaf1   :  { %1647 = vmatprep.mubr.msk.bf16.mxu1 %vm1943_vm1, %v1942_v15  ;;  %1644 = vmatpush3.bf16.msra.mxu1 %v1711_v60 }
 0xaf2   :  { %v1048_v6 = vpack.c.bf16 %v1046_v43, %v1046_v43  ;;  %1645 = vmatprep.subr.bf16.mxu1 %v1942_v15 }
 0xaf4   :  { %1640 = vmatmul.mubr.msk.bf16.vlgmr.msra.gmra.mxu0 %vm264_vm2, %v1048_v6  ;;  %v1486_v6 = vld [vmem:[#allocation5 + $0x3] ss:$0 sm:$0xff] }
 0xaf5   :  { %1655 = vmatprep.mubr.msk.bf16.mxu0 %vm1943_vm1, %v1942_v15  ;;  %1646 = vmatpush3.bf16.msra.mxu1 %v1712_v52 }
 0xaf6   :  { %1659 = vmatprep.subr.bf16.mxu1 %v1942_v15  ;;  %1652 = vmatpush3.bf16.msra.mxu0 %v1713_v51 }
 0xaf7   :  { %1653 = vmatprep.subr.bf16.mxu0 %v1942_v15 }
 0xafa   :  { %1654 = vmatpush3.bf16.msra.mxu0 %v1714_v7 }
 0xbb0   :  { %v1091_v61 = vpop.f32.mrf.mxu1 }
 0xbb2   :  { %v1635_v62 = vpop.f32.mrf.mxu1 }
 0xbb4   :  { %v1094_v63 = vpop.f32.mrf.mxu1  ;;  %v1139_v2 = vpop.f32.mrf.mxu0 }
 0xbb5   :  { %v1704_v3 = vpack.i.bf16 %v1139_v2, %v1091_v61  ;;  %v1715_v63 = vld [vmem:[#allocation13 + $0x8] sm:$0xff]   ;;  %v1716_v2 = vld [vmem:[#allocation13] sm:$0xff]  }
 0xbb6   :  { %v1636_v4 = vpop.f32.mrf.mxu1  ;;  %v1641_v5 = vpop.f32.mrf.mxu0 }
 0xbb7   :  { %1705 = vrot.lane.b32.xlu0 %v1704_v3, %s1956_s22  ;;  %v1487_v3 = vld [vmem:[#allocation7 + $0x4] ss:$0 sm:$0xff] }
 0xbb8   :  { %v1142_v8 = vpop.f32.mrf.mxu0 }
 0xbba   :  { %v1642_v9 = vpop.f32.mrf.mxu0 }
 0xc29   :  { %v1706_v16 = vpop.permute.xlu0 %1705 }
 0xc2a   :  { %v1708_v19 = vunpack.i.h.bf16 %v1706_v16  ;;  %v1707_v20 = vunpack.i.l.bf16 %v1706_v16 }
 0xc2c   :  { %v1176_v23 = vsel %vm1174_vm5, %v1173_v22, %v1708_v19  ;;  %v1175_v24 = vsel %vm1174_vm5, %v1172_v21, %v1707_v20 }
 0xc2d   :  { %v1177_v25 = vpack.c.bf16 %v1176_v23, %v1175_v24 }
 0xc2f   :  { %1648 = vmatmul.mubr.msk.bf16.vlgmr.msra.gmra.mxu1 %vm125_vm0, %v1177_v25 }
 0xc30   :  { %1663 = vmatprep.mubr.msk.bf16.mxu1 %vm1943_vm1, %v1942_v15  ;;  %1660 = vmatpush3.bf16.msra.mxu1 %v1715_v63 }
 0xc31   :  { %1661 = vmatprep.subr.bf16.mxu1 %v1942_v15 }
 0xc34   :  { %1662 = vmatpush3.bf16.msra.mxu1 %v1716_v2 }
 0xcef   :  { %v1236_v28 = vpop.f32.mrf.mxu1 }
 0xcf0   :  { %v1237_v29 = vadd.f32 %v1481_v26, %v1236_v28 }
 0xcf1   :  { %v1649_v32 = vpop.f32.mrf.mxu1 }
 0xcf2   :  { %v2216_v40 = vadd.f32 %v1237_v29, %v2034_v0 }
 0xcf3   :  { %v1239_v36 = vpop.f32.mrf.mxu1 }
 0xcf4   :  { %v1240_v33 = vadd.f32 %v1481_v26, %v1239_v36  ;;  %v1245_v34 = vsel %vm125_vm0, %v2216_v40, 0.0  ;;  %v1491_v36 = vld [vmem:[#allocation7 + $0x5] ss:$0 sm:$0xff] }
 0xcf5   :  { %1246 = vadd.xlane.f32.xlu1 %v1245_v34  ;;  %v1650_v35 = vpop.f32.mrf.mxu1 }
 0xcf6   :  { %v2221_v37 = vadd.f32 %v1240_v33, %v2036_v1 }
 0xcf8   :  { %v1248_v38 = vsel %vm125_vm0, %v2221_v37, 0.0 }
 0xcf9   :  { %1249 = vadd.xlane.f32.xlu0 %v1248_v38 }
 0xd7e   :  { %v1247_v41 = vpop.xlane.xlu1 %1246 }
 0xd7f   :  { %v1251_v42 = vmul.f32 0.03125, %v1247_v41 }
 0xd81   :  { %v1253_v44 = vsub.f32 %v2216_v40, %v1251_v42 }
 0xd82   :  { %v1250_v0 = vpop.xlane.xlu0 %1249 }
 0xd83   :  { %v1252_v45 = vmul.f32 0.03125, %v1250_v0  ;;  %v1255_v46 = vmul.f32 %v1253_v44, %v1253_v44 }
 0xd85   :  { %v1254_v47 = vsub.f32 %v2221_v37, %v1252_v45  ;;  %v1257_v48 = vsel %vm125_vm0, %v1255_v46, 0.0 }
 0xd86   :  { %1258 = vadd.xlane.f32.xlu0 %v1257_v48 }
 0xd87   :  { %v1256_v49 = vmul.f32 %v1254_v47, %v1254_v47 }
 0xd89   :  { %v1260_v1 = vsel %vm125_vm0, %v1256_v49, 0.0 }
 0xd8a   :  { %1261 = vadd.xlane.f32.xlu0 %v1260_v1 }
 0xe0f   :  { %v1259_v27 = vpop.xlane.xlu0 %1258 }
 0xe10   :  { %v1263_v30 = vmul.f32 0.03125, %v1259_v27 }
 0xe12   :  { %v1265_v31 = vadd.f32 1e-05, %v1263_v30 }
 0xe13   :  { %v1262_v53 = vpop.xlane.xlu0 %1261 }
 0xe14   :  { %1753 = vrsqrt.f32 %v1265_v31  ;;  %v1264_v54 = vmul.f32 0.03125, %v1262_v53 }
 0xe16   :  { %v1266_v55 = vadd.f32 1e-05, %v1264_v54 }
 0xe18   :  { %1755 = vrsqrt.f32 %v1266_v55 }
 0xe21   :  { %v1754_v56 = vpop.eup %1753 }
 0xe22   :  { %v1269_v57 = vmul.f32 %v1754_v56, %v1253_v44 }
 0xe24   :  { %v1275_v43 = vmul.f32 %v1485_v58, %v1269_v57 }
 0xe25   :  { %v1756_v59 = vpop.eup %1755 }
 0xe26   :  { %v1270_v39 = vmul.f32 %v1756_v59, %v1254_v47  ;;  %v1281_v52 = vadd.f32 %v1486_v6, %v1275_v43 }
 0xe28   :  { %v1276_v60 = vmul.f32 %v1485_v58, %v1270_v39 }
 0xe2a   :  { %v1282_v61 = vadd.f32 %v1486_v6, %v1276_v60 }
 0xe2c   :  { %v1283_v62 = vpack.c.bf16 %v1282_v61, %v1281_v52 }
 0xe2e   :  { %1656 = vmatmul.mubr.msk.bf16.vlgmr.msra.gmra.mxu0 %vm125_vm0, %v1283_v62 }
 0xeee   :  { %v1342_v4 = vpop.f32.mrf.mxu0 }
 0xeef   :  { %v1343_v5 = vadd.f32 %v1487_v3, %v1342_v4 }
 0xef0   :  { %v1657_v8 = vpop.f32.mrf.mxu0 }
 0xef1   :  { %v1349_v9 = vmul.f32 %v1343_v5, %v1343_v5 }
 0xef2   :  { %v1345_v10 = vpop.f32.mrf.mxu0 }
 0xef3   :  { %v1351_v50 = vmul.f32 %v1349_v9, %v1343_v5  ;;  %v1346_v11 = vadd.f32 %v1487_v3, %v1345_v10 }
 0xef4   :  { %v1658_v12 = vpop.f32.mrf.mxu0 }
 0xef5   :  { %v1353_v13 = vmul.f32 0.044715, %v1351_v50  ;;  %v1350_v14 = vmul.f32 %v1346_v11, %v1346_v11 }
 0xef7   :  { %v1355_v16 = vadd.f32 %v1353_v13, %v1343_v5  ;;  %v1352_v17 = vmul.f32 %v1350_v14, %v1346_v11 }
 0xef9   :  { %v1357_v18 = vmul.f32 0.7978846, %v1355_v16  ;;  %v1354_v19 = vmul.f32 0.044715, %v1352_v17 }
 0xefb   :  { %1757 = vtanh.f32 %v1357_v18  ;;  %v1356_v20 = vadd.f32 %v1354_v19, %v1346_v11 }
 0xefd   :  { %v1358_v15 = vmul.f32 0.7978846, %v1356_v20 }
 0xeff   :  { %1759 = vtanh.f32 %v1358_v15 }
 0xf08   :  { %v1758_v21 = vpop.eup %1757 }
 0xf09   :  { %v1361_v22 = vadd.f32 1.0, %v1758_v21 }
 0xf0b   :  { %v1363_v24 = vmul.f32 0.5, %v1361_v22 }
 0xf0c   :  { %v1760_v23 = vpop.eup %1759 }
 0xf0d   :  { %v1362_v25 = vadd.f32 1.0, %v1760_v23  ;;  %v1365_v28 = vmul.f32 %v1363_v24, %v1343_v5 }
 0xf0f   :  { %v1364_v26 = vmul.f32 0.5, %v1362_v25 }
 0xf11   :  { %v1366_v29 = vmul.f32 %v1364_v26, %v1346_v11 }
 0xf13   :  { %v1367_v32 = vpack.c.bf16 %v1366_v29, %v1365_v28 }
 0xf15   :  { %1664 = vmatmul.mubr.msk.bf16.vlgmr.msra.gmra.mxu1 %vm125_vm0, %v1367_v32 }
 0xfd5   :  { %v1426_v33 = vpop.f32.mrf.mxu1 }
 0xfd6   :  { %v1427_v34 = vadd.f32 %v1491_v36, %v1426_v33 }
 0xfd7   :  { %v1665_v35 = vpop.f32.mrf.mxu1 }
 0xfd8   :  { %v1433_v38 = vadd.f32 %v1427_v34, %v2216_v40 }
 0xfd9   :  { %v1429_v41 = vpop.f32.mrf.mxu1 }
 0xfda   :  { %1435 = vst.msk [vmem:[#allocation14] sm:$0xff] %vm125_vm0, %v1433_v38  ;;  %v1430_v42 = vadd.f32 %v1491_v36, %v1429_v41 }
 0xfdb   :  { %v1666_v44 = vpop.f32.mrf.mxu1 }
 0xfdc   :  { %v1434_v0 = vadd.f32 %v1430_v42, %v2221_v37 }
 0xfde   :  { %1436 = vst.msk [vmem:[#allocation14 + $0x8] sm:$0xff] %vm125_vm0, %v1434_v0 }
 0xfdf   :  { %1912 = shalt.err (!%p1909_p11)
}
 0xfe0   :  { %1448 = dma.vmem_to_hbm [thread:$0]  %s1443_s24, 256, %s2250_s7, [#allocation4], %s1937_s19, %s1937_s19, %s1938_s20  }
 0xfe1   :  { %1929 = dma.done.wait [#allocation4], 256  }
 0xfe2   :  { %1930 = vsyncadd [#allocation4], 4294967040 }
 0xfe3   :  { %1452 = vsyncpa [#allocation3], 1 }
 0xfe4   :  { %1453 = vsyncpa [#allocation6], 1 }
 0xfe5   :  { %1454 = vsyncpa [#allocation9], 1 }
 0xfe6   :  { %1455 = vsyncpa [#allocation12], 1 }
 0xfe7   :  { %1456 = vsyncpa [#allocation4], 1 }

</bundles_post_ra>
